<compile_context>
chip_gen: v6e
topology: v6e:2x2x1
jax: 0.10.0
libtpu: 0.0.40
codegen_flags: <defaults>
</compile_context>

<pallas_src>
import numpy as np
import jax
import jax.numpy as jnp
from jax.experimental import pallas as pl
from jax.experimental.pallas import tpu as pltpu

# ---- configuration (mirrors the PyTorch `args`) -----------------------------
HRF_LENGTH = 10.0            # seconds
TEMPORAL_RES = 100.0         # hrf_temporal_resolution (samples / second)
HRF_LEN = int(HRF_LENGTH * TEMPORAL_RES)   # 1000
PAD = 499                    # hard-coded padding in F.conv1d(...)
HRF_STRIDE = 25              # args.hrf_stride
HRF_N_PARAMS = 6             # args.hrf_n_parameters

RD_INIT, UD_INIT = 6.0, 12.0           # response / undershoot delay init
RDIS_INIT, UDIS_INIT = 0.9, 0.9        # response / undershoot dispersion init
RS_INIT, US_INIT = 1.0, 0.035          # response / undershoot scale init
DISP_DEV, SCALE_DEV = 0.1, 0.1         # dispersion_deviation / scale_deviation

MLP_DIMS = [HRF_N_PARAMS, 128, 512, 128, HRF_N_PARAMS]
LANE = 128
MAX_PARCELS_PER_STEP = 8


# ---- host-side (pure JAX) HRF synthesis --------------------------------------
def _synthesize_hrfs(params):
  """Batched-over-parcels MLP + tanh re-parameterisation + double-gamma HRF.

  TODO(synk): intentionally hoisted out of the Pallas kernel — per-parcel M=1
  matmuls are latency/HBM bound and would waste MXU/grid steps in-kernel.
  """
  x0 = jnp.array([RD_INIT, UD_INIT, RDIS_INIT, UDIS_INIT, RS_INIT, US_INIT],
                 jnp.float32)                                        # (6,)
  h = jax.nn.gelu(jnp.einsum('j,pjk->pk', x0, params["w1"]) + params["b1"][:, 0, :],
                  approximate=False)
  h = jax.nn.gelu(jnp.einsum('pj,pjk->pk', h, params["w2"]) + params["b2"][:, 0, :],
                  approximate=False)
  h = jax.nn.gelu(jnp.einsum('pj,pjk->pk', h, params["w3"]) + params["b3"][:, 0, :],
                  approximate=False)
  y = jnp.einsum('pj,pjk->pk', h, params["w4"]) + params["b4"][:, 0, :]  # (P, 6)

  rd = jnp.tanh(y[:, 0]) * (2.0 / 6.0) * RD_INIT + RD_INIT
  ud = jnp.tanh(y[:, 1]) * (2.0 / 12.0) * UD_INIT + UD_INIT
  rdi = jnp.tanh(y[:, 2]) * DISP_DEV * RDIS_INIT + RDIS_INIT
  udi = jnp.tanh(y[:, 3]) * DISP_DEV * UDIS_INIT + UDIS_INIT
  rs = jnp.tanh(y[:, 4]) * SCALE_DEV * RS_INIT + RS_INIT
  us = jnp.tanh(y[:, 5]) * SCALE_DEV * US_INIT + US_INIT

  tt = jnp.arange(HRF_LEN, dtype=jnp.float32) / TEMPORAL_RES          # (HRF_LEN,)

  def gamma(delay, dispersion, scale):
    peak = delay * dispersion                                         # (P,)
    pw = jnp.power(tt[None, :] / peak[:, None], delay[:, None])
    ex = jnp.exp(-(tt[None, :] - peak[:, None]) / dispersion[:, None])
    return scale[:, None] * pw * ex

  return gamma(rd, rdi, rs) - gamma(ud, udi, us)                      # (P, HRF_LEN)


def _shifted_hrf_matrix(hrf, T, l_out, l_pad):
  """H[p, j, i] = hrf[p, j + PAD - i*stride] (zero outside the HRF support and for
  i >= l_out).  With this matrix, the padded / strided F.conv1d becomes
  out[p, b, i] = sum_j x[p, b, j] * H[p, j, i] against the *unpadded* x."""
  j = jnp.arange(T, dtype=jnp.int32)[:, None]              # (T, 1)
  i = jnp.arange(l_pad, dtype=jnp.int32)[None, :]          # (1, l_pad)
  k = j + PAD - i * HRF_STRIDE                             # (T, l_pad)
  valid = (k >= 0) & (k < HRF_LEN) & (i < l_out)
  k_c = jnp.clip(k, 0, HRF_LEN - 1)
  return jnp.where(valid[None, :, :], hrf[:, k_c], 0.0)    # (P, T, l_pad)


# ---- the Pallas kernel: G parcels per grid step -------------------------------
def corr_kernel(x_ref, h_ref, o_ref):
  # x: (G, B, T), h: (G, T, L_pad) -> o: (G, B, L_pad); batched MXU matmul
  # (same batched-dot_general pattern as the flash-attention reference kernel).
  o_ref[...] = jnp.einsum('gbt,gtl->gbl', x_ref[...], h_ref[...],
                          preferred_element_type=jnp.float32)


# ---- wrapper -------------------------------------------------------------------
def per_parcel_hrf_forward(x_ele, params):
  B, P, T = x_ele.shape
  l_out = (T + 2 * PAD - HRF_LEN) // HRF_STRIDE + 1
  l_pad = ((l_out + LANE - 1) // LANE) * LANE              # lane-dense output

  hrf = _synthesize_hrfs(params)                           # (P, HRF_LEN)
  H = _shifted_hrf_matrix(hrf, T, l_out, l_pad)            # (P, T, l_pad)
  x_pp = jnp.transpose(x_ele, (1, 0, 2)).astype(jnp.float32)   # (P, B, T), unpadded

  # batch G parcels per grid step (fills sublanes / amortizes per-step overhead)
  G = min(P, MAX_PARCELS_PER_STEP)
  P_pad = ((P + G - 1) // G) * G
  if P_pad != P:
    x_pp = jnp.pad(x_pp, ((0, P_pad - P), (0, 0), (0, 0)))
    H = jnp.pad(H, ((0, P_pad - P), (0, 0), (0, 0)))

  out = pl.pallas_call(
      corr_kernel,
      out_shape=jax.ShapeDtypeStruct((P_pad, B, l_pad), jnp.float32),
      grid_spec=pltpu.PrefetchScalarGridSpec(
          num_scalar_prefetch=0,
          grid=(P_pad // G,),
          in_specs=[pl.BlockSpec((G, B, T), lambda g: (g, 0, 0)),
                    pl.BlockSpec((G, T, l_pad), lambda g: (g, 0, 0))],
          out_specs=pl.BlockSpec((G, B, l_pad), lambda g: (g, 0, 0)),
      ),
      compiler_params=pltpu.CompilerParams(
          dimension_semantics=("parallel",),
          vmem_limit_bytes=32 * 1024 * 1024),
  )(x_pp, H)

  # torch.cat of per-parcel (B, 1, l_out) blocks along dim 0 -> (P*B, 1, l_out)
  return out[:P, :, :l_out].reshape(P * B, 1, l_out)


per_parcel_hrf_forward_jit = jax.jit(per_parcel_hrf_forward)


# ---- deterministic parameter init (PyTorch nn.Linear default: U(+-1/sqrt(in)))
def init_params(key, n_parcels):
  params = {}
  keys = jax.random.split(key, 2 * (len(MLP_DIMS) - 1))
  for li in range(len(MLP_DIMS) - 1):
    fan_in, fan_out = MLP_DIMS[li], MLP_DIMS[li + 1]
    bound = 1.0 / np.sqrt(fan_in)
    params[f"w{li + 1}"] = jax.random.uniform(
        keys[2 * li], (n_parcels, fan_in, fan_out), jnp.float32, -bound, bound)
    params[f"b{li + 1}"] = jax.random.uniform(
        keys[2 * li + 1], (n_parcels, 1, fan_out), jnp.float32, -bound, bound)
  return params


# ---- pure-JAX reference (mirrors the PyTorch forward, per-parcel loop + conv) ---
@jax.jit
def reference_forward(x_ele, params):
  B, P, T = x_ele.shape
  x0 = jnp.array([[RD_INIT, UD_INIT, RDIS_INIT, UDIS_INIT, RS_INIT, US_INIT]],
                 jnp.float32)
  t = jnp.arange(HRF_LEN, dtype=jnp.float32)
  outs = []
  for p in range(P):
    h = jax.nn.gelu(x0 @ params["w1"][p] + params["b1"][p], approximate=False)
    h = jax.nn.gelu(h @ params["w2"][p] + params["b2"][p], approximate=False)
    h = jax.nn.gelu(h @ params["w3"][p] + params["b3"][p], approximate=False)
    y = (h @ params["w4"][p] + params["b4"][p])[0]
    rd = jnp.tanh(y[0]) * (2.0 / 6.0) * RD_INIT + RD_INIT
    ud = jnp.tanh(y[1]) * (2.0 / 12.0) * UD_INIT + UD_INIT
    rdi = jnp.tanh(y[2]) * DISP_DEV * RDIS_INIT + RDIS_INIT
    udi = jnp.tanh(y[3]) * DISP_DEV * UDIS_INIT + UDIS_INIT
    rs = jnp.tanh(y[4]) * SCALE_DEV * RS_INIT + RS_INIT
    us = jnp.tanh(y[5]) * SCALE_DEV * US_INIT + US_INIT
    rp, up = rd * rdi, ud * udi
    resp = rs * jnp.power(t / TEMPORAL_RES / rp, rd) * jnp.exp(-(t / TEMPORAL_RES - rp) / rdi)
    under = us * jnp.power(t / TEMPORAL_RES / up, ud) * jnp.exp(-(t / TEMPORAL_RES - up) / udi)
    hrf = resp - under                                          # (HRF_LEN,)
    # F.conv1d(x[:, p, :].unsqueeze(1), hrf[None, None], padding=499, stride=25)
    out_p = jax.lax.conv_general_dilated(
        x_ele[:, p, :][:, None, :],                             # (B, 1, T)
        hrf[None, None, :],                                     # (1, 1, HRF_LEN)
        window_strides=(HRF_STRIDE,),
        padding=[(PAD, PAD)],
        dimension_numbers=('NCH', 'OIH', 'NCH'),
        precision=jax.lax.Precision.HIGHEST)                    # (B, 1, l_out)
    outs.append(out_p)
  return jnp.concatenate(outs, axis=0)                          # (P*B, 1, l_out)


if __name__ == "__main__":
  P, B, T = 4, 2, 1000
  key = jax.random.PRNGKey(0)
  k_params, k_x = jax.random.split(key)
  params = init_params(k_params, P)
  x_ele = jax.random.normal(k_x, (B, P, T), jnp.float32)

  out = jax.block_until_ready(per_parcel_hrf_forward_jit(x_ele, params))
  l_out = (T + 2 * PAD - HRF_LEN) // HRF_STRIDE + 1
  assert out.shape == (P * B, 1, l_out), out.shape

  ref = jax.block_until_ready(reference_forward(x_ele, params))
  np.testing.assert_allclose(np.asarray(out), np.asarray(ref),
                             rtol=5e-3, atol=5e-3)
  print("KERNEL_OK")
</pallas_src>

<mosaic_0001>
module attributes {stable_mosaic.version = 11 : i64} {
  func.func @corr_kernel(%arg0: i32, %arg1: memref<4x2x1000xf32, #tpu.memory_space<vmem>>, %arg2: memref<4x1000x128xf32, #tpu.memory_space<vmem>>, %arg3: memref<4x2x128xf32, #tpu.memory_space<vmem>>) attributes {dimension_semantics = [#tpu.dimension_semantics<parallel>], iteration_bounds = array<i64: 1>, scalar_prefetch = 0 : i64, scratch_operands = 0 : i64, tpu.core_type = #tpu.core_type<tc>, window_params = [{transform_indices = @transform_0, window_bounds = array<i64: 4, 2, 1000>}, {transform_indices = @transform_1, window_bounds = array<i64: 4, 1000, 128>}, {transform_indices = @transform_2, window_bounds = array<i64: 4, 2, 128>}]} {
    %c0 = arith.constant 0 : index
    %c0_0 = arith.constant 0 : index
    %c0_1 = arith.constant 0 : index
    %0 = vector.load %arg1[%c0, %c0_0, %c0_1] : memref<4x2x1000xf32, #tpu.memory_space<vmem>>, vector<4x2x1000xf32>
    %c0_2 = arith.constant 0 : index
    %c0_3 = arith.constant 0 : index
    %c0_4 = arith.constant 0 : index
    %1 = vector.load %arg2[%c0_2, %c0_3, %c0_4] : memref<4x1000x128xf32, #tpu.memory_space<vmem>>, vector<4x1000x128xf32>
    "tpu.trace_start"() <{level = 10 : i32, message = "gbt,gtl->gbl"}> : () -> ()
    %cst = arith.constant dense<0.000000e+00> : vector<4x2x128xf32>
    %2 = tpu.matmul %0, %1, %cst {dimension_numbers = #tpu.dot_dimension_numbers<[2], [1], [1], [2], [0, 0, 0, 1, 1, 2], [0], [0]>} : vector<4x2x1000xf32>, vector<4x1000x128xf32>, vector<4x2x128xf32> -> vector<4x2x128xf32>
    "tpu.trace_stop"() : () -> ()
    %c0_5 = arith.constant 0 : index
    %c0_6 = arith.constant 0 : index
    %c0_7 = arith.constant 0 : index
    %3 = vector.load %arg3[%c0_5, %c0_6, %c0_7] : memref<4x2x128xf32, #tpu.memory_space<vmem>>, vector<4x2x128xf32>
    tpu.vector_store %arg3[%c0_5, %c0_6, %c0_7], %2 {strides = array<i32>} : memref<4x2x128xf32, #tpu.memory_space<vmem>>, vector<4x2x128xf32>,
    return
  }
  func.func @transform_0(%arg0: i32) -> (i32, i32, i32) {
    %c0_i32 = arith.constant 0 : i32
    %c0_i32_0 = arith.constant 0 : i32
    %c0_i32_1 = arith.constant 0 : i32
    return %arg0, %c0_i32, %c0_i32_0 : i32, i32, i32
  }
  func.func @transform_1(%arg0: i32) -> (i32, i32, i32) {
    %c0_i32 = arith.constant 0 : i32
    %c0_i32_0 = arith.constant 0 : i32
    %c0_i32_1 = arith.constant 0 : i32
    return %arg0, %c0_i32, %c0_i32_0 : i32, i32, i32
  }
  func.func @transform_2(%arg0: i32) -> (i32, i32, i32) {
    %c0_i32 = arith.constant 0 : i32
    %c0_i32_0 = arith.constant 0 : i32
    %c0_i32_1 = arith.constant 0 : i32
    return %arg0, %c0_i32, %c0_i32_0 : i32, i32, i32
  }
}

</mosaic_0001>

<bundles_post_ra>
// kernel: per_parcel_hrf_forward.1
= control target key start
LH: loop header
LB: loop body
LE: loop exit
PB: predicated region body
PF: predicated region fallthrough
CT: control target
= control target key end

     0   :  { %v2300_v3 = vmov 0.0   ;;  %v2301_v23 = vmov 1983009808   ;;  %v526_v25 = vlaneseq  ;;  %vm563_vm0 = vcmask 850944   ;;  %s4028_s0 = inlined_call_operand.vmem [shape: f32[4,2,1000], index: 0, kind: input, shape index: {}]   ;;  %s4029_s1 = inlined_call_operand.vmem [shape: f32[4,1000,128], index: 1, kind: input, shape index: {}]   ;;  %s4030_s2 = inlined_call_operand.hbm [shape: f32[4,2,128], index: 2, kind: output, shape index: {}]  }
   0x1   :  { %v51_v0 = vld [vmem:[%s4029_s1 + $0xf8] sm:$0xff]  ;;  %776 = vmatprep.subr.mxu1 %v2300_v3  ;;  %v50_v4 = vld [vmem:[%s4029_s1 + $0xf0] sm:$0xff]  ;;  %v49_v7 = vld [vmem:[%s4029_s1 + $0xe8] sm:$0xff]  ;;  %v524_v24 = vunpack.c.l.s4 %v2301_v23 }
   0x2   :  { %v35_v1 = vld [vmem:[%s4029_s1 + $0x78] sm:$0xff]  ;;  %1845 = vmatprep.subr.mxu0 %v51_v0  ;;  %v34_v5 = vld [vmem:[%s4029_s1 + $0x70] sm:$0xff]  ;;  %v33_v8 = vld [vmem:[%s4029_s1 + $0x68] sm:$0xff]  ;;  %v527_v33 = vshrl.u32 %v526_v25, 7 }
   0x3   :  { %v131_v2 = vld [vmem:[%s4029_s1 + $0x378] sm:$0xff]  ;;  %v130_v6 = vld [vmem:[%s4029_s1 + $0x370] sm:$0xff]  ;;  %1846 = vmatpush3.msra.mxu0 %v35_v1  ;;  %v129_v9 = vld [vmem:[%s4029_s1 + $0x368] sm:$0xff]  ;;  %v525_v32 = vunpack.c.0.s8 %v524_v24 }
   0x4   :  { %777 = vmatpush1.msra.mxu1 %v131_v2  ;;  %1847 = vmatprep.subr.mxu0 %v50_v4  ;;  %v48_v10 = vld [vmem:[%s4029_s1 + $0xe0] sm:$0xff]  ;;  %v47_v13 = vld [vmem:[%s4029_s1 + $0xd8] sm:$0xff]  ;;  %v46_v16 = vld [vmem:[%s4029_s1 + $0xd0] sm:$0xff] }
   0x5   :  { %778 = vmatprep.subr.mxu1 %v2300_v3  ;;  %1848 = vmatpush3.msra.mxu0 %v34_v5  ;;  %v32_v11 = vld [vmem:[%s4029_s1 + $0x60] sm:$0xff]  ;;  %v31_v14 = vld [vmem:[%s4029_s1 + $0x58] sm:$0xff]  ;;  %v30_v17 = vld [vmem:[%s4029_s1 + $0x50] sm:$0xff]  ;;  %v2432_v40 = vsub.s32 %v525_v32, %v527_v33 }
   0x6   :  { %779 = vmatpush1.msra.mxu1 %v130_v6  ;;  %1849 = vmatprep.subr.mxu0 %v49_v7  ;;  %v128_v12 = vld [vmem:[%s4029_s1 + $0x360] sm:$0xff]  ;;  %v127_v15 = vld [vmem:[%s4029_s1 + $0x358] sm:$0xff]  ;;  %v126_v18 = vld [vmem:[%s4029_s1 + $0x350] sm:$0xff] }
   0x7   :  { %780 = vmatprep.subr.mxu1 %v2300_v3  ;;  %1850 = vmatpush3.msra.mxu0 %v33_v8  ;;  %v45_v19 = vld [vmem:[%s4029_s1 + $0xc8] sm:$0xff]  ;;  %v44_v22 = vld [vmem:[%s4029_s1 + $0xc0] sm:$0xff]  ;;  %v43_v28 = vld [vmem:[%s4029_s1 + $0xb8] sm:$0xff] }
   0x8   :  { %781 = vmatpush1.msra.mxu1 %v129_v9  ;;  %1851 = vmatprep.subr.mxu0 %v48_v10  ;;  %v29_v20 = vld [vmem:[%s4029_s1 + $0x48] sm:$0xff]  ;;  %v28_v26 = vld [vmem:[%s4029_s1 + $0x40] sm:$0xff]  ;;  %v27_v29 = vld [vmem:[%s4029_s1 + $0x38] sm:$0xff] }
   0x9   :  { %782 = vmatprep.subr.mxu1 %v2300_v3  ;;  %1852 = vmatpush3.msra.mxu0 %v32_v11  ;;  %v125_v21 = vld [vmem:[%s4029_s1 + $0x348] sm:$0xff]  ;;  %v124_v27 = vld [vmem:[%s4029_s1 + $0x340] sm:$0xff]  ;;  %v123_v30 = vld [vmem:[%s4029_s1 + $0x338] sm:$0xff] }
   0xa   :  { %783 = vmatpush1.msra.mxu1 %v128_v12  ;;  %1853 = vmatprep.subr.mxu0 %v47_v13  ;;  %v42_v31 = vld [vmem:[%s4029_s1 + $0xb0] sm:$0xff]  ;;  %v41_v36 = vld [vmem:[%s4029_s1 + $0xa8] sm:$0xff]  ;;  %v40_v39 = vld [vmem:[%s4029_s1 + $0xa0] sm:$0xff] }
   0xb   :  { %784 = vmatprep.subr.mxu1 %v2300_v3  ;;  %1854 = vmatpush3.msra.mxu0 %v31_v14  ;;  %v26_v34 = vld [vmem:[%s4029_s1 + $0x30] sm:$0xff]  ;;  %v25_v37 = vld [vmem:[%s4029_s1 + $0x28] sm:$0xff]  ;;  %v24_v41 = vld [vmem:[%s4029_s1 + $0x20] sm:$0xff] }
   0xc   :  { %785 = vmatpush1.msra.mxu1 %v127_v15  ;;  %1855 = vmatprep.subr.mxu0 %v46_v16  ;;  %v122_v35 = vld [vmem:[%s4029_s1 + $0x330] sm:$0xff]  ;;  %v121_v38 = vld [vmem:[%s4029_s1 + $0x328] sm:$0xff]  ;;  %v120_v42 = vld [vmem:[%s4029_s1 + $0x320] sm:$0xff] }
   0xd   :  { %786 = vmatprep.subr.mxu1 %v2300_v3  ;;  %1856 = vmatpush3.msra.mxu0 %v30_v17  ;;  %v2444_v43 = vld [vmem:[%s4028_s0] sm:$0xff]  ;;  %v39_v44 = vld [vmem:[%s4029_s1 + $0x98] sm:$0xff]  ;;  %v38_v47 = vld [vmem:[%s4029_s1 + $0x90] sm:$0xff] }
   0xe   :  { %787 = vmatpush1.msra.mxu1 %v126_v18  ;;  %1857 = vmatprep.subr.mxu0 %v45_v19  ;;  %v23_v45 = vld [vmem:[%s4029_s1 + $0x18] sm:$0xff]  ;;  %v529_v48 = vrot.slane %v2444_v43, %v2432_v40  ;;  %v22_v49 = vld [vmem:[%s4029_s1 + $0x10] sm:$0xff]  ;;  %v37_v51 = vld [vmem:[%s4029_s1 + $0x88] sm:$0xff]  ;;  %v522_v32 = vcombine.high %v2444_v43, %v2444_v43 }
   0xf   :  { %788 = vmatprep.subr.mxu1 %v2300_v3  ;;  %1858 = vmatpush3.msra.mxu0 %v29_v20  ;;  %v119_v46 = vld [vmem:[%s4029_s1 + $0x318] sm:$0xff]  ;;  %v118_v50 = vld [vmem:[%s4029_s1 + $0x310] sm:$0xff]  ;;  %v21_v52 = vld [vmem:[%s4029_s1 + $0x8] sm:$0xff] }
  0x10   :  { %789 = vmatpush1.msra.mxu1 %v125_v21  ;;  %1859 = vmatprep.subr.mxu0 %v44_v22  ;;  %v117_v53 = vld [vmem:[%s4029_s1 + $0x308] sm:$0xff]  ;;  %v36_v54 = vld [vmem:[%s4029_s1 + $0x80] sm:$0xff]  ;;  %v537_v55 = vcombine.high %v529_v48, %v529_v48  ;;  %v83_v58 = vld [vmem:[%s4029_s1 + $0x1f8] sm:$0xff]  ;;  %v536_v43 = vrot.slane %v522_v32, %v2432_v40 }
  0x11   :  { %790 = vmatprep.subr.mxu1 %v2300_v3  ;;  %1860 = vmatpush3.msra.mxu0 %v28_v26  ;;  %v20_v56 = vld [vmem:[%s4029_s1] sm:$0xff]  ;;  %v67_v59 = vld [vmem:[%s4029_s1 + $0x178] sm:$0xff]  ;;  %v82_v61 = vld [vmem:[%s4029_s1 + $0x1f0] sm:$0xff] }
  0x12   :  { %791 = vmatpush1.msra.mxu1 %v124_v27  ;;  %1861 = vmatprep.subr.mxu0 %v43_v28  ;;  %v116_v57 = vld [vmem:[%s4029_s1 + $0x300] sm:$0xff]  ;;  %v66_v62 = vld [vmem:[%s4029_s1 + $0x170] sm:$0xff]  ;;  %v143_v63 = vld [vmem:[%s4029_s1 + $0x3d8] sm:$0xff] }
  0x13   :  { %792 = vmatprep.subr.mxu1 %v2300_v3  ;;  %1862 = vmatpush3.msra.mxu0 %v27_v29  ;;  %v144_v60 = vld [vmem:[%s4029_s1 + $0x3e0] sm:$0xff]  ;;  %v81_v0 = vld [vmem:[%s4029_s1 + $0x1e8] sm:$0xff]  ;;  %v142_v2 = vld [vmem:[%s4029_s1 + $0x3d0] sm:$0xff] }
  0x14   :  { %793 = vmatpush1.msra.mxu1 %v123_v30  ;;  %1863 = vmatprep.subr.mxu0 %v42_v31  ;;  %v65_v1 = vld [vmem:[%s4029_s1 + $0x168] sm:$0xff]  ;;  %v80_v4 = vld [vmem:[%s4029_s1 + $0x1e0] sm:$0xff]  ;;  %v79_v7 = vld [vmem:[%s4029_s1 + $0x1d8] sm:$0xff] }
  0x15   :  { %794 = vmatprep.subr.mxu1 %v2300_v3  ;;  %1864 = vmatpush3.msra.mxu0 %v26_v34  ;;  %v64_v5 = vld [vmem:[%s4029_s1 + $0x160] sm:$0xff]  ;;  %v141_v6 = vld [vmem:[%s4029_s1 + $0x3c8] sm:$0xff]  ;;  %v63_v8 = vld [vmem:[%s4029_s1 + $0x158] sm:$0xff] }
  0x16   :  { %795 = vmatpush1.msra.mxu1 %v122_v35  ;;  %1865 = vmatprep.subr.mxu0 %v41_v36  ;;  %v140_v9 = vld [vmem:[%s4029_s1 + $0x3c0] sm:$0xff]  ;;  %v78_v10 = vld [vmem:[%s4029_s1 + $0x1d0] sm:$0xff]  ;;  %v139_v12 = vld [vmem:[%s4029_s1 + $0x3b8] sm:$0xff] }
  0x17   :  { %796 = vmatprep.subr.mxu1 %v2300_v3  ;;  %1866 = vmatpush3.msra.mxu0 %v25_v37  ;;  %v62_v11 = vld [vmem:[%s4029_s1 + $0x150] sm:$0xff]  ;;  %v77_v13 = vld [vmem:[%s4029_s1 + $0x1c8] sm:$0xff]  ;;  %v76_v16 = vld [vmem:[%s4029_s1 + $0x1c0] sm:$0xff] }
  0x18   :  { %797 = vmatpush1.msra.mxu1 %v121_v38  ;;  %1867 = vmatprep.subr.mxu0 %v40_v39  ;;  %v61_v14 = vld [vmem:[%s4029_s1 + $0x148] sm:$0xff]  ;;  %v138_v15 = vld [vmem:[%s4029_s1 + $0x3b0] sm:$0xff]  ;;  %v60_v18 = vld [vmem:[%s4029_s1 + $0x140] sm:$0xff] }
  0x19   :  { %798 = vmatprep.subr.mxu1 %v2300_v3  ;;  %1868 = vmatpush3.msra.mxu0 %v24_v41  ;;  %v2564_v17 = vld [vmem:[%s4028_s0 + $0x8] sm:$0xff]  ;;  %v75_v20 = vld [vmem:[%s4029_s1 + $0x1b8] sm:$0xff]  ;;  %v136_v22 = vld [vmem:[%s4029_s1 + $0x3a0] sm:$0xff] }
  0x1a   :  { %799 = vmatpush1.msra.mxu1 %v120_v42  ;;  %1869 = vmatprep.subr.mxu0 %v39_v44  ;;  %v137_v19 = vld [vmem:[%s4029_s1 + $0x3a8] sm:$0xff]  ;;  %v59_v21 = vld [vmem:[%s4029_s1 + $0x138] sm:$0xff]  ;;  %v539_v23 = vcombine.high %v2564_v17, %v2564_v17  ;;  %v74_v24 = vld [vmem:[%s4029_s1 + $0x1b0] sm:$0xff] }
  0x1b   :  { %800 = vmatprep.subr.mxu1 %v2300_v3  ;;  %1870 = vmatpush3.msra.mxu0 %v23_v45  ;;  %v58_v25 = vld [vmem:[%s4029_s1 + $0x130] sm:$0xff]  ;;  %v135_v26 = vld [vmem:[%s4029_s1 + $0x398] sm:$0xff]  ;;  %v73_v27 = vld [vmem:[%s4029_s1 + $0x1a8] sm:$0xff] }
  0x1c   :  { %801 = vmatpush1.msra.mxu1 %v119_v46  ;;  %1871 = vmatprep.subr.mxu0 %v38_v47  ;;  %v57_v28 = vld [vmem:[%s4029_s1 + $0x128] sm:$0xff]  ;;  %v134_v29 = vld [vmem:[%s4029_s1 + $0x390] sm:$0xff]  ;;  %v553_v30 = vrot.slane %v539_v23, %v2432_v40  ;;  %v72_v31 = vld [vmem:[%s4029_s1 + $0x1a0] sm:$0xff] }
  0x1d   :  { %802 = vmatprep.subr.mxu1 %v2300_v3  ;;  %1872 = vmatpush3.msra.mxu0 %v22_v49  ;;  %v56_v33 = vld [vmem:[%s4029_s1 + $0x120] sm:$0xff]  ;;  %v133_v34 = vld [vmem:[%s4029_s1 + $0x388] sm:$0xff]  ;;  %v71_v35 = vld [vmem:[%s4029_s1 + $0x198] sm:$0xff] }
  0x1e   :  { %803 = vmatpush1.msra.mxu1 %v118_v50  ;;  %1873 = vmatprep.subr.mxu0 %v37_v51  ;;  %v55_v36 = vld [vmem:[%s4029_s1 + $0x118] sm:$0xff]  ;;  %v132_v37 = vld [vmem:[%s4029_s1 + $0x380] sm:$0xff]  ;;  %v555_v38 = vcombine.high %v553_v30, %v553_v30  ;;  %v70_v39 = vld [vmem:[%s4029_s1 + $0x190] sm:$0xff]  ;;  %v538_v51 = vcombine.high %v536_v43, %v536_v43 }
  0x1f   :  { %804 = vmatprep.subr.mxu1 %v2300_v3  ;;  %1874 = vmatpush3.msra.mxu0 %v21_v52  ;;  %v208_v41 = vld [vmem:[%s4029_s1 + $0x5e0] sm:$0xff]  ;;  %v54_v42 = vld [vmem:[%s4029_s1 + $0x110] sm:$0xff]  ;;  %v69_v44 = vld [vmem:[%s4029_s1 + $0x188] sm:$0xff] }
  0x20   :  { %805 = vmatpush1.msra.mxu1 %v117_v53  ;;  %1875 = vmatprep.subr.mxu0 %v36_v54  ;;  %v192_v45 = vld [vmem:[%s4029_s1 + $0x560] sm:$0xff]  ;;  %v53_v46 = vld [vmem:[%s4029_s1 + $0x108] sm:$0xff]  ;;  %v207_v47 = vld [vmem:[%s4029_s1 + $0x5d8] sm:$0xff] }
  0x21   :  { %806 = vmatprep.subr.mxu1 %v2300_v3  ;;  %1876 = vmatpush3.msra.mxu0 %v20_v56  ;;  %v191_v49 = vld [vmem:[%s4029_s1 + $0x558] sm:$0xff]  ;;  %v52_v50 = vld [vmem:[%s4029_s1 + $0x100] sm:$0xff]  ;;  %v206_v52 = vld [vmem:[%s4029_s1 + $0x5d0] sm:$0xff] }
  0x22   :  { %630 = vmatprep.mubr.f32.mxu0 %v537_v55  ;;  %807 = vmatpush1.msra.mxu1 %v116_v57  ;;  %v190_v53 = vld [vmem:[%s4029_s1 + $0x550] sm:$0xff]  ;;  %v115_v54 = vld [vmem:[%s4029_s1 + $0x2f8] sm:$0xff]  ;;  %v205_v55 = vld [vmem:[%s4029_s1 + $0x5c8] sm:$0xff] }
  0x23   :  { %631 = vmatmul.mubr.f32.vlgmr.msra.gmra.mxu0 %v529_v48  ;;  %1880 = vmatprep.subr.mxu0 %v83_v58  ;;  %v68_v48 = vld [vmem:[%s4029_s1 + $0x180] sm:$0xff]  ;;  %v99_v56 = vld [vmem:[%s4029_s1 + $0x278] sm:$0xff]  ;;  %v189_v57 = vld [vmem:[%s4029_s1 + $0x548] sm:$0xff] }
  0x24   :  { %814 = vmatprep.subr.mxu1 %v2300_v3  ;;  %1881 = vmatpush3.msra.mxu0 %v67_v59  ;;  %v114_v58 = vld [vmem:[%s4029_s1 + $0x2f0] sm:$0xff]  ;;  %v204_v59 = vld [vmem:[%s4029_s1 + $0x5c0] sm:$0xff] }
  0x25   :  { %815 = vmatpush2.msra.mxu1 %v144_v60  ;;  %1882 = vmatprep.subr.mxu0 %v82_v61  ;;  %v98_v60 = vld [vmem:[%s4029_s1 + $0x270] sm:$0xff]  ;;  %v188_v61 = vld [vmem:[%s4029_s1 + $0x540] sm:$0xff] }
  0x26   :  { %816 = vmatprep.subr.mxu1 %v2300_v3  ;;  %1883 = vmatpush3.msra.mxu0 %v66_v62  ;;  %v113_v62 = vld [vmem:[%s4029_s1 + $0x2e8] sm:$0xff]  ;;  %v92_v23 = vld [vmem:[%s4029_s1 + $0x240] sm:$0xff]  ;;  %v90_v32 = vld [vmem:[%s4029_s1 + $0x230] sm:$0xff] }
  0x27   :  { %817 = vmatpush2.msra.mxu1 %v143_v63  ;;  %1884 = vmatprep.subr.mxu0 %v81_v0  ;;  %v203_v63 = vld [vmem:[%s4029_s1 + $0x5b8] sm:$0xff]  ;;  %v97_v0 = vld [vmem:[%s4029_s1 + $0x268] sm:$0xff] }
  0x28   :  { %818 = vmatprep.subr.mxu1 %v2300_v3  ;;  %1885 = vmatpush3.msra.mxu0 %v65_v1  ;;  %v187_v1 = vld [vmem:[%s4029_s1 + $0x538] sm:$0xff] }
  0x29   :  { %819 = vmatpush2.msra.mxu1 %v142_v2  ;;  %1886 = vmatprep.subr.mxu0 %v80_v4  ;;  %v112_v2 = vld [vmem:[%s4029_s1 + $0x2e0] sm:$0xff]  ;;  %v202_v4 = vld [vmem:[%s4029_s1 + $0x5b0] sm:$0xff] }
  0x2a   :  { %820 = vmatprep.subr.mxu1 %v2300_v3  ;;  %1887 = vmatpush3.msra.mxu0 %v64_v5  ;;  %v96_v5 = vld [vmem:[%s4029_s1 + $0x260] sm:$0xff] }
  0x2b   :  { %821 = vmatpush2.msra.mxu1 %v141_v6  ;;  %1888 = vmatprep.subr.mxu0 %v79_v7  ;;  %v186_v6 = vld [vmem:[%s4029_s1 + $0x530] sm:$0xff]  ;;  %v111_v7 = vld [vmem:[%s4029_s1 + $0x2d8] sm:$0xff] }
  0x2c   :  { %822 = vmatprep.subr.mxu1 %v2300_v3  ;;  %1889 = vmatpush3.msra.mxu0 %v63_v8  ;;  %v201_v8 = vld [vmem:[%s4029_s1 + $0x5a8] sm:$0xff] }
  0x2d   :  { %823 = vmatpush2.msra.mxu1 %v140_v9  ;;  %1890 = vmatprep.subr.mxu0 %v78_v10  ;;  %v95_v9 = vld [vmem:[%s4029_s1 + $0x258] sm:$0xff]  ;;  %v185_v10 = vld [vmem:[%s4029_s1 + $0x528] sm:$0xff] }
  0x2e   :  { %824 = vmatprep.subr.mxu1 %v2300_v3  ;;  %1891 = vmatpush3.msra.mxu0 %v62_v11  ;;  %v110_v11 = vld [vmem:[%s4029_s1 + $0x2d0] sm:$0xff] }
  0x2f   :  { %825 = vmatpush2.msra.mxu1 %v139_v12  ;;  %1892 = vmatprep.subr.mxu0 %v77_v13  ;;  %v200_v12 = vld [vmem:[%s4029_s1 + $0x5a0] sm:$0xff]  ;;  %v94_v13 = vld [vmem:[%s4029_s1 + $0x250] sm:$0xff] }
  0x30   :  { %826 = vmatprep.subr.mxu1 %v2300_v3  ;;  %1893 = vmatpush3.msra.mxu0 %v61_v14  ;;  %v184_v14 = vld [vmem:[%s4029_s1 + $0x520] sm:$0xff] }
  0x31   :  { %827 = vmatpush2.msra.mxu1 %v138_v15  ;;  %1894 = vmatprep.subr.mxu0 %v76_v16  ;;  %v109_v15 = vld [vmem:[%s4029_s1 + $0x2c8] sm:$0xff]  ;;  %v199_v16 = vld [vmem:[%s4029_s1 + $0x598] sm:$0xff] }
  0x32   :  { %828 = vmatprep.subr.mxu1 %v2300_v3  ;;  %1895 = vmatpush3.msra.mxu0 %v60_v18  ;;  %v93_v18 = vld [vmem:[%s4029_s1 + $0x248] sm:$0xff] }
  0x33   :  { %829 = vmatpush2.msra.mxu1 %v137_v19  ;;  %1896 = vmatprep.subr.mxu0 %v75_v20  ;;  %v183_v19 = vld [vmem:[%s4029_s1 + $0x518] sm:$0xff]  ;;  %v108_v20 = vld [vmem:[%s4029_s1 + $0x2c0] sm:$0xff] }
  0x34   :  { %830 = vmatprep.subr.mxu1 %v2300_v3  ;;  %1897 = vmatpush3.msra.mxu0 %v59_v21  ;;  %v198_v21 = vld [vmem:[%s4029_s1 + $0x590] sm:$0xff] }
  0x35   :  { %831 = vmatpush2.msra.mxu1 %v136_v22  ;;  %1898 = vmatprep.subr.mxu0 %v74_v24  ;;  %v2760_v22 = vld [vmem:[%s4028_s0 + $0x10] sm:$0xff] }
  0x36   :  { %832 = vmatprep.subr.mxu1 %v2300_v3  ;;  %1899 = vmatpush3.msra.mxu0 %v58_v25  ;;  %v182_v24 = vld [vmem:[%s4029_s1 + $0x510] sm:$0xff]  ;;  %v107_v25 = vld [vmem:[%s4029_s1 + $0x2b8] sm:$0xff] }
  0x37   :  { %833 = vmatpush2.msra.mxu1 %v135_v26  ;;  %1900 = vmatprep.subr.mxu0 %v73_v27  ;;  %v197_v26 = vld [vmem:[%s4029_s1 + $0x588] sm:$0xff]  ;;  %v91_v27 = vld [vmem:[%s4029_s1 + $0x238] sm:$0xff] }
  0x38   :  { %834 = vmatprep.subr.mxu1 %v2300_v3  ;;  %1901 = vmatpush3.msra.mxu0 %v57_v28  ;;  %v181_v28 = vld [vmem:[%s4029_s1 + $0x508] sm:$0xff] }
  0x39   :  { %835 = vmatpush2.msra.mxu1 %v134_v29  ;;  %1902 = vmatprep.subr.mxu0 %v72_v31  ;;  %v848_v29 = vcombine.high %v2760_v22, %v2760_v22  ;;  %v196_v31 = vld [vmem:[%s4029_s1 + $0x580] sm:$0xff] }
  0x3a   :  { %836 = vmatprep.subr.mxu1 %v2300_v3  ;;  %1903 = vmatpush3.msra.mxu0 %v56_v33  ;;  %v180_v33 = vld [vmem:[%s4029_s1 + $0x500] sm:$0xff] }
  0x3b   :  { %837 = vmatpush2.msra.mxu1 %v133_v34  ;;  %1904 = vmatprep.subr.mxu0 %v71_v35  ;;  %v105_v34 = vld [vmem:[%s4029_s1 + $0x2a8] sm:$0xff]  ;;  %v195_v35 = vld [vmem:[%s4029_s1 + $0x578] sm:$0xff] }
  0x3c   :  { %838 = vmatprep.subr.mxu1 %v2300_v3  ;;  %1905 = vmatpush3.msra.mxu0 %v55_v36  ;;  %v89_v36 = vld [vmem:[%s4029_s1 + $0x228] sm:$0xff] }
  0x3d   :  { %839 = vmatpush2.msra.mxu1 %v132_v37  ;;  %1906 = vmatprep.subr.mxu0 %v70_v39  ;;  %v179_v37 = vld [vmem:[%s4029_s1 + $0x4f8] sm:$0xff]  ;;  %v104_v39 = vld [vmem:[%s4029_s1 + $0x2a0] sm:$0xff] }
  0x3e   :  { %1841 = vmatprep.mubr.msk.f32.mxu1 %vm563_vm0, %v555_v38  ;;  %1985 = vmatprep.subr.mxu1 %v208_v41  ;;  %v862_v38 = vrot.slane %v848_v29, %v2432_v40  ;;  %v194_v41 = vld [vmem:[%s4029_s1 + $0x570] sm:$0xff] }
  0x3f   :  { %1907 = vmatpush3.msra.mxu0 %v54_v42  ;;  %841 = vmatmul.mubr.f32.vlgmr.msra.gmra.mxu1 %v553_v30  ;;  %v106_v30 = vld [vmem:[%s4029_s1 + $0x2b0] sm:$0xff]  ;;  %v88_v42 = vld [vmem:[%s4029_s1 + $0x220] sm:$0xff] }
  0x40   :  { %1908 = vmatprep.subr.mxu0 %v69_v44  ;;  %1986 = vmatpush3.msra.mxu1 %v192_v45  ;;  %v103_v44 = vld [vmem:[%s4029_s1 + $0x298] sm:$0xff]  ;;  %v193_v45 = vld [vmem:[%s4029_s1 + $0x568] sm:$0xff]  ;;  %v150_v29 = vld [vmem:[%s4029_s1 + $0x410] sm:$0xff] }
  0x41   :  { %1909 = vmatpush3.msra.mxu0 %v53_v46  ;;  %1987 = vmatprep.subr.mxu1 %v207_v47  ;;  %v87_v46 = vld [vmem:[%s4029_s1 + $0x218] sm:$0xff]  ;;  %v177_v47 = vld [vmem:[%s4029_s1 + $0x4e8] sm:$0xff] }
  0x42   :  { %1910 = vmatprep.subr.mxu0 %v68_v48  ;;  %1988 = vmatpush3.msra.mxu1 %v191_v49  ;;  %v864_v48 = vcombine.high %v862_v38, %v862_v38  ;;  %v102_v49 = vld [vmem:[%s4029_s1 + $0x290] sm:$0xff] }
  0x43   :  { %1911 = vmatpush3.msra.mxu0 %v52_v50  ;;  %1989 = vmatprep.subr.mxu1 %v206_v52  ;;  %v86_v50 = vld [vmem:[%s4029_s1 + $0x210] sm:$0xff]  ;;  %v101_v52 = vld [vmem:[%s4029_s1 + $0x288] sm:$0xff] }
  0x44   :  { %700 = vmatprep.mubr.f32.mxu0 %v538_v51  ;;  %1990 = vmatpush3.msra.mxu1 %v190_v53  ;;  %v546_v51 = vrot.slane %v2564_v17, %v2432_v40  ;;  %v256_v53 = vld [vmem:[%s4029_s1 + $0x760] sm:$0xff] }
  0x45   :  { %701 = vmatmul.mubr.f32.vlgmr.msra.gmra.mxu0 %v536_v43  ;;  %1915 = vmatprep.subr.mxu0 %v115_v54  ;;  %v178_v43 = vld [vmem:[%s4029_s1 + $0x4f0] sm:$0xff]  ;;  %v85_v54 = vld [vmem:[%s4029_s1 + $0x208] sm:$0xff]  ;;  %v100_v17 = vld [vmem:[%s4029_s1 + $0x280] sm:$0xff] }
  0x46   :  { %1991 = vmatprep.subr.mxu1 %v205_v55  ;;  %1916 = vmatpush3.msra.mxu0 %v99_v56  ;;  %v255_v55 = vld [vmem:[%s4029_s1 + $0x758] sm:$0xff]  ;;  %v84_v56 = vld [vmem:[%s4029_s1 + $0x200] sm:$0xff] }
  0x47   :  { %1992 = vmatpush3.msra.mxu1 %v189_v57  ;;  %1917 = vmatprep.subr.mxu0 %v114_v58  ;;  %v554_v57 = vcombine.high %v546_v51, %v546_v51  ;;  %v254_v58 = vld [vmem:[%s4029_s1 + $0x750] sm:$0xff] }
  0x48   :  { %1993 = vmatprep.subr.mxu1 %v204_v59  ;;  %1918 = vmatpush3.msra.mxu0 %v98_v60  ;;  %v176_v59 = vld [vmem:[%s4029_s1 + $0x4e0] sm:$0xff] }
  0x49   :  { %1994 = vmatpush3.msra.mxu1 %v188_v61  ;;  %1919 = vmatprep.subr.mxu0 %v113_v62  ;;  %v160_v60 = vld [vmem:[%s4029_s1 + $0x460] sm:$0xff]  ;;  %v253_v61 = vld [vmem:[%s4029_s1 + $0x748] sm:$0xff]  ;;  %v175_v62 = vld [vmem:[%s4029_s1 + $0x4d8] sm:$0xff] }
  0x4a   :  { %1995 = vmatprep.subr.mxu1 %v203_v63  ;;  %1920 = vmatpush3.msra.mxu0 %v97_v0  ;;  %v159_v63 = vld [vmem:[%s4029_s1 + $0x458] sm:$0xff]  ;;  %v252_v0 = vld [vmem:[%s4029_s1 + $0x740] sm:$0xff] }
  0x4b   :  { %1996 = vmatpush3.msra.mxu1 %v187_v1  ;;  %1921 = vmatprep.subr.mxu0 %v112_v2  ;;  %v174_v1 = vld [vmem:[%s4029_s1 + $0x4d0] sm:$0xff] }
  0x4c   :  { %1997 = vmatprep.subr.mxu1 %v202_v4  ;;  %1922 = vmatpush3.msra.mxu0 %v96_v5  ;;  %v158_v2 = vld [vmem:[%s4029_s1 + $0x450] sm:$0xff]  ;;  %v251_v4 = vld [vmem:[%s4029_s1 + $0x738] sm:$0xff]  ;;  %v173_v5 = vld [vmem:[%s4029_s1 + $0x4c8] sm:$0xff] }
  0x4d   :  { %1998 = vmatpush3.msra.mxu1 %v186_v6  ;;  %1923 = vmatprep.subr.mxu0 %v111_v7  ;;  %v157_v6 = vld [vmem:[%s4029_s1 + $0x448] sm:$0xff]  ;;  %v250_v7 = vld [vmem:[%s4029_s1 + $0x730] sm:$0xff] }
  0x4e   :  { %1999 = vmatprep.subr.mxu1 %v201_v8  ;;  %1924 = vmatpush3.msra.mxu0 %v95_v9  ;;  %v172_v8 = vld [vmem:[%s4029_s1 + $0x4c0] sm:$0xff] }
  0x4f   :  { %2000 = vmatpush3.msra.mxu1 %v185_v10  ;;  %1925 = vmatprep.subr.mxu0 %v110_v11  ;;  %v156_v9 = vld [vmem:[%s4029_s1 + $0x440] sm:$0xff]  ;;  %v249_v10 = vld [vmem:[%s4029_s1 + $0x728] sm:$0xff]  ;;  %v171_v11 = vld [vmem:[%s4029_s1 + $0x4b8] sm:$0xff] }
  0x50   :  { %2001 = vmatprep.subr.mxu1 %v200_v12  ;;  %1926 = vmatpush3.msra.mxu0 %v94_v13  ;;  %v155_v12 = vld [vmem:[%s4029_s1 + $0x438] sm:$0xff]  ;;  %v248_v13 = vld [vmem:[%s4029_s1 + $0x720] sm:$0xff] }
  0x51   :  { %2002 = vmatpush3.msra.mxu1 %v184_v14  ;;  %1927 = vmatprep.subr.mxu0 %v109_v15  ;;  %v170_v14 = vld [vmem:[%s4029_s1 + $0x4b0] sm:$0xff] }
  0x52   :  { %2003 = vmatprep.subr.mxu1 %v199_v16  ;;  %1928 = vmatpush3.msra.mxu0 %v93_v18  ;;  %v154_v15 = vld [vmem:[%s4029_s1 + $0x430] sm:$0xff]  ;;  %v247_v16 = vld [vmem:[%s4029_s1 + $0x718] sm:$0xff]  ;;  %v169_v18 = vld [vmem:[%s4029_s1 + $0x4a8] sm:$0xff] }
  0x53   :  { %2004 = vmatpush3.msra.mxu1 %v183_v19  ;;  %1929 = vmatprep.subr.mxu0 %v108_v20  ;;  %v153_v19 = vld [vmem:[%s4029_s1 + $0x428] sm:$0xff]  ;;  %v246_v20 = vld [vmem:[%s4029_s1 + $0x710] sm:$0xff] }
  0x54   :  { %2005 = vmatprep.subr.mxu1 %v198_v21  ;;  %1930 = vmatpush3.msra.mxu0 %v92_v23  ;;  %v168_v21 = vld [vmem:[%s4029_s1 + $0x4a0] sm:$0xff] }
  0x55   :  { %2006 = vmatpush3.msra.mxu1 %v182_v24  ;;  %1931 = vmatprep.subr.mxu0 %v107_v25  ;;  %v152_v23 = vld [vmem:[%s4029_s1 + $0x420] sm:$0xff]  ;;  %v245_v24 = vld [vmem:[%s4029_s1 + $0x708] sm:$0xff]  ;;  %v167_v25 = vld [vmem:[%s4029_s1 + $0x498] sm:$0xff] }
  0x56   :  { %2007 = vmatprep.subr.mxu1 %v197_v26  ;;  %1932 = vmatpush3.msra.mxu0 %v91_v27  ;;  %v151_v26 = vld [vmem:[%s4029_s1 + $0x418] sm:$0xff]  ;;  %v244_v27 = vld [vmem:[%s4029_s1 + $0x700] sm:$0xff] }
  0x57   :  { %2008 = vmatpush3.msra.mxu1 %v181_v28  ;;  %1933 = vmatprep.subr.mxu0 %v106_v30  ;;  %v166_v28 = vld [vmem:[%s4029_s1 + $0x490] sm:$0xff]  ;;  %v243_v30 = vld [vmem:[%s4029_s1 + $0x6f8] sm:$0xff] }
  0x58   :  { %2009 = vmatprep.subr.mxu1 %v196_v31  ;;  %1934 = vmatpush3.msra.mxu0 %v90_v32  ;;  %v165_v31 = vld [vmem:[%s4029_s1 + $0x488] sm:$0xff] }
  0x59   :  { %2010 = vmatpush3.msra.mxu1 %v180_v33  ;;  %1935 = vmatprep.subr.mxu0 %v105_v34  ;;  %v149_v32 = vld [vmem:[%s4029_s1 + $0x408] sm:$0xff]  ;;  %v242_v33 = vld [vmem:[%s4029_s1 + $0x6f0] sm:$0xff]  ;;  %v164_v34 = vld [vmem:[%s4029_s1 + $0x480] sm:$0xff] }
  0x5a   :  { %2011 = vmatprep.subr.mxu1 %v195_v35  ;;  %1936 = vmatpush3.msra.mxu0 %v89_v36  ;;  %v148_v35 = vld [vmem:[%s4029_s1 + $0x400] sm:$0xff]  ;;  %v241_v36 = vld [vmem:[%s4029_s1 + $0x6e8] sm:$0xff] }
  0x5b   :  { %2012 = vmatpush3.msra.mxu1 %v179_v37  ;;  %1937 = vmatprep.subr.mxu0 %v104_v39  ;;  %v163_v37 = vld [vmem:[%s4029_s1 + $0x478] sm:$0xff] }
  0x5c   :  { %2013 = vmatprep.subr.mxu1 %v194_v41  ;;  %1938 = vmatpush3.msra.mxu0 %v88_v42  ;;  %v147_v39 = vld [vmem:[%s4029_s1 + $0x3f8] sm:$0xff]  ;;  %v269_v41 = vld [vmem:[%s4029_s1 + $0x7c8] sm:$0xff]  ;;  %v162_v42 = vld [vmem:[%s4029_s1 + $0x470] sm:$0xff] }
  0x5d   :  { %2014 = vmatpush3.msra.mxu1 %v178_v43  ;;  %1939 = vmatprep.subr.mxu0 %v103_v44  ;;  %v268_v43 = vld [vmem:[%s4029_s1 + $0x7c0] sm:$0xff]  ;;  %v161_v44 = vld [vmem:[%s4029_s1 + $0x468] sm:$0xff] }
  0x5e   :  { %2015 = vmatprep.subr.mxu1 %v193_v45  ;;  %1940 = vmatpush3.msra.mxu0 %v87_v46  ;;  %v145_v46 = vld [vmem:[%s4029_s1 + $0x3e8] sm:$0xff] }
  0x5f   :  { %2016 = vmatpush3.msra.mxu1 %v177_v47  ;;  %1941 = vmatprep.subr.mxu0 %v102_v49  ;;  %v267_v47 = vld [vmem:[%s4029_s1 + $0x7b8] sm:$0xff]  ;;  %v224_v49 = vld [vmem:[%s4029_s1 + $0x660] sm:$0xff] }
  0x60   :  { %1025 = vmatprep.mubr.f32.mxu1 %v864_v48  ;;  %1101 = vmatprep.subr.mxu1 %v2300_v3  ;;  %v240_v48 = vld [vmem:[%s4029_s1 + $0x6e0] sm:$0xff] }
  0x61   :  { %1942 = vmatpush3.msra.mxu0 %v86_v50  ;;  %1026 = vmatmul.mubr.f32.vlgmr.msra.gmra.mxu1 %v862_v38  ;;  %v855_v38 = vrot.slane %v2760_v22, %v2432_v40  ;;  %v146_v22 = vld [vmem:[%s4029_s1 + $0x3f0] sm:$0xff] }
  0x62   :  { %1943 = vmatprep.subr.mxu0 %v101_v52  ;;  %1102 = vmatpush1.msra.mxu1 %v256_v53  ;;  %v266_v50 = vld [vmem:[%s4029_s1 + $0x7b0] sm:$0xff]  ;;  %v223_v52 = vld [vmem:[%s4029_s1 + $0x658] sm:$0xff]  ;;  %v265_v53 = vld [vmem:[%s4029_s1 + $0x7a8] sm:$0xff] }
  0x63   :  { %1944 = vmatpush3.msra.mxu0 %v85_v54  ;;  %1103 = vmatprep.subr.mxu1 %v2300_v3  ;;  %v863_v45 = vcombine.high %v855_v38, %v855_v38  ;;  %v238_v54 = vld [vmem:[%s4029_s1 + $0x6d0] sm:$0xff] }
  0x64   :  { %1945 = vmatprep.subr.mxu0 %v100_v17  ;;  %1104 = vmatpush1.msra.mxu1 %v255_v55  ;;  %v222_v17 = vld [vmem:[%s4029_s1 + $0x650] sm:$0xff]  ;;  %v264_v55 = vld [vmem:[%s4029_s1 + $0x7a0] sm:$0xff] }
  0x65   :  { %1946 = vmatpush3.msra.mxu0 %v84_v56  ;;  %1105 = vmatprep.subr.mxu1 %v2300_v3  ;;  %v237_v56 = vld [vmem:[%s4029_s1 + $0x6c8] sm:$0xff] }
  0x66   :  { %770 = vmatprep.mubr.f32.mxu0 %v554_v57  ;;  %1106 = vmatpush1.msra.mxu1 %v254_v58  ;;  %v221_v57 = vld [vmem:[%s4029_s1 + $0x648] sm:$0xff]  ;;  %v263_v58 = vld [vmem:[%s4029_s1 + $0x798] sm:$0xff] }
  0x67   :  { %771 = vmatmul.mubr.f32.vlgmr.msra.gmra.mxu0 %v546_v51  ;;  %1950 = vmatprep.subr.mxu0 %v176_v59  ;;  %v239_v51 = vld [vmem:[%s4029_s1 + $0x6d8] sm:$0xff]  ;;  %v236_v59 = vld [vmem:[%s4029_s1 + $0x6c0] sm:$0xff] }
  0x68   :  { %1107 = vmatprep.subr.mxu1 %v2300_v3  ;;  %1951 = vmatpush3.msra.mxu0 %v160_v60  ;;  %v3070_v60 = vld [vmem:[%s4028_s0 + $0x18] sm:$0xff] }
  0x69   :  { %1108 = vmatpush1.msra.mxu1 %v253_v61  ;;  %1952 = vmatprep.subr.mxu0 %v175_v62  ;;  %v220_v61 = vld [vmem:[%s4029_s1 + $0x640] sm:$0xff]  ;;  %v262_v62 = vld [vmem:[%s4029_s1 + $0x790] sm:$0xff] }
  0x6a   :  { %1109 = vmatprep.subr.mxu1 %v2300_v3  ;;  %1953 = vmatpush3.msra.mxu0 %v159_v63  ;;  %v235_v63 = vld [vmem:[%s4029_s1 + $0x6b8] sm:$0xff] }
  0x6b   :  { %1110 = vmatpush1.msra.mxu1 %v252_v0  ;;  %1954 = vmatprep.subr.mxu0 %v174_v1  ;;  %v219_v0 = vld [vmem:[%s4029_s1 + $0x638] sm:$0xff]  ;;  %v261_v1 = vld [vmem:[%s4029_s1 + $0x788] sm:$0xff] }
  0x6c   :  { %1111 = vmatprep.subr.mxu1 %v2300_v3  ;;  %1955 = vmatpush3.msra.mxu0 %v158_v2  ;;  %v865_v2 = vcombine.high %v3070_v60, %v3070_v60 }
  0x6d   :  { %1112 = vmatpush1.msra.mxu1 %v251_v4  ;;  %1956 = vmatprep.subr.mxu0 %v173_v5  ;;  %v234_v4 = vld [vmem:[%s4029_s1 + $0x6b0] sm:$0xff] }
  0x6e   :  { %1113 = vmatprep.subr.mxu1 %v2300_v3  ;;  %1957 = vmatpush3.msra.mxu0 %v157_v6  ;;  %v218_v5 = vld [vmem:[%s4029_s1 + $0x630] sm:$0xff]  ;;  %v260_v6 = vld [vmem:[%s4029_s1 + $0x780] sm:$0xff] }
  0x6f   :  { %1114 = vmatpush1.msra.mxu1 %v250_v7  ;;  %1958 = vmatprep.subr.mxu0 %v172_v8 }
  0x70   :  { %1115 = vmatprep.subr.mxu1 %v2300_v3  ;;  %1959 = vmatpush3.msra.mxu0 %v156_v9 }
  0x71   :  { %1116 = vmatpush1.msra.mxu1 %v249_v10  ;;  %1960 = vmatprep.subr.mxu0 %v171_v11 }
  0x72   :  { %1117 = vmatprep.subr.mxu1 %v2300_v3  ;;  %1961 = vmatpush3.msra.mxu0 %v155_v12 }
  0x73   :  { %1118 = vmatpush1.msra.mxu1 %v248_v13  ;;  %1962 = vmatprep.subr.mxu0 %v170_v14 }
  0x74   :  { %1119 = vmatprep.subr.mxu1 %v2300_v3  ;;  %1963 = vmatpush3.msra.mxu0 %v154_v15 }
  0x75   :  { %1120 = vmatpush1.msra.mxu1 %v247_v16  ;;  %1964 = vmatprep.subr.mxu0 %v169_v18 }
  0x76   :  { %1121 = vmatprep.subr.mxu1 %v2300_v3  ;;  %1965 = vmatpush3.msra.mxu0 %v153_v19 }
  0x77   :  { %1122 = vmatpush1.msra.mxu1 %v246_v20  ;;  %1966 = vmatprep.subr.mxu0 %v168_v21 }
  0x78   :  { %1123 = vmatprep.subr.mxu1 %v2300_v3  ;;  %1967 = vmatpush3.msra.mxu0 %v152_v23 }
  0x79   :  { %1124 = vmatpush1.msra.mxu1 %v245_v24  ;;  %1968 = vmatprep.subr.mxu0 %v167_v25 }
  0x7a   :  { %1125 = vmatprep.subr.mxu1 %v2300_v3  ;;  %1969 = vmatpush3.msra.mxu0 %v151_v26 }
  0x7b   :  { %1126 = vmatpush1.msra.mxu1 %v244_v27  ;;  %1970 = vmatprep.subr.mxu0 %v166_v28 }
  0x7c   :  { %1127 = vmatprep.subr.mxu1 %v2300_v3  ;;  %1971 = vmatpush3.msra.mxu0 %v150_v29 }
  0x7d   :  { %1128 = vmatpush1.msra.mxu1 %v243_v30  ;;  %1972 = vmatprep.subr.mxu0 %v165_v31 }
  0x7e   :  { %1129 = vmatprep.subr.mxu1 %v2300_v3  ;;  %1973 = vmatpush3.msra.mxu0 %v149_v32 }
  0x7f   :  { %1130 = vmatpush1.msra.mxu1 %v242_v33  ;;  %1974 = vmatprep.subr.mxu0 %v164_v34 }
  0x80   :  { %1131 = vmatprep.subr.mxu1 %v2300_v3  ;;  %1975 = vmatpush3.msra.mxu0 %v148_v35 }
  0x81   :  { %1132 = vmatpush1.msra.mxu1 %v241_v36  ;;  %1976 = vmatprep.subr.mxu0 %v163_v37 }
  0x82   :  { %1139 = vmatprep.subr.mxu1 %v2300_v3  ;;  %1977 = vmatpush3.msra.mxu0 %v147_v39 }
  0x83   :  { %1140 = vmatpush2.msra.mxu1 %v269_v41  ;;  %1978 = vmatprep.subr.mxu0 %v162_v42 }
  0x84   :  { %1141 = vmatprep.subr.mxu1 %v2300_v3  ;;  %1979 = vmatpush3.msra.mxu0 %v146_v22 }
  0x85   :  { %1142 = vmatpush2.msra.mxu1 %v268_v43  ;;  %1980 = vmatprep.subr.mxu0 %v161_v44 }
  0x86   :  { %1143 = vmatprep.subr.mxu1 %v2300_v3  ;;  %1981 = vmatpush3.msra.mxu0 %v145_v46 }
  0x87   :  { %955 = vmatprep.mubr.f32.mxu0 %v863_v45  ;;  %1144 = vmatpush2.msra.mxu1 %v267_v47 }
  0x88   :  { %956 = vmatmul.mubr.f32.vlgmr.msra.gmra.mxu0 %v855_v38  ;;  %2020 = vmatprep.subr.mxu0 %v240_v48 }
  0x89   :  { %1145 = vmatprep.subr.mxu1 %v2300_v3  ;;  %2021 = vmatpush3.msra.mxu0 %v224_v49 }
  0x8a   :  { %1146 = vmatpush2.msra.mxu1 %v266_v50  ;;  %2022 = vmatprep.subr.mxu0 %v239_v51 }
  0x8b   :  { %1147 = vmatprep.subr.mxu1 %v2300_v3  ;;  %2023 = vmatpush3.msra.mxu0 %v223_v52 }
  0x8c   :  { %1148 = vmatpush2.msra.mxu1 %v265_v53  ;;  %2024 = vmatprep.subr.mxu0 %v238_v54 }
  0x8d   :  { %1149 = vmatprep.subr.mxu1 %v2300_v3  ;;  %2025 = vmatpush3.msra.mxu0 %v222_v17 }
  0x8e   :  { %1150 = vmatpush2.msra.mxu1 %v264_v55  ;;  %2026 = vmatprep.subr.mxu0 %v237_v56 }
  0x8f   :  { %1151 = vmatprep.subr.mxu1 %v2300_v3  ;;  %2027 = vmatpush3.msra.mxu0 %v221_v57 }
  0x90   :  { %1152 = vmatpush2.msra.mxu1 %v263_v58  ;;  %2028 = vmatprep.subr.mxu0 %v236_v59 }
  0x91   :  { %1153 = vmatprep.subr.mxu1 %v2300_v3  ;;  %2029 = vmatpush3.msra.mxu0 %v220_v61 }
  0x92   :  { %1154 = vmatpush2.msra.mxu1 %v262_v62  ;;  %2030 = vmatprep.subr.mxu0 %v235_v63 }
  0x93   :  { %1155 = vmatprep.subr.mxu1 %v2300_v3 }
  0x94   :  { %7 = vsyncpa [#allocation3], 0  ;;  %2031 = vmatpush3.msra.mxu0 %v219_v0  ;;  %1156 = vmatpush2.msra.mxu1 %v261_v1  ;;  %v233_v7 = vld [vmem:[%s4029_s1 + $0x6a8] sm:$0xff]  ;;  %v259_v9 = vld [vmem:[%s4029_s1 + $0x778] sm:$0xff]  ;;  %v879_v10 = vrot.slane %v865_v2, %v2432_v40  ;;  %v872_v34 = vrot.slane %v3070_v60, %v2432_v40 }
  0x95   :  { %2032 = vmatprep.subr.mxu0 %v234_v4  ;;  %1157 = vmatprep.subr.mxu1 %v2300_v3  ;;  %v217_v8 = vld [vmem:[%s4029_s1 + $0x628] sm:$0xff]  ;;  %v232_v11 = vld [vmem:[%s4029_s1 + $0x6a0] sm:$0xff]  ;;  %v258_v13 = vld [vmem:[%s4029_s1 + $0x770] sm:$0xff] }
  0x96   :  { %2033 = vmatpush3.msra.mxu0 %v218_v5  ;;  %1158 = vmatpush2.msra.mxu1 %v260_v6  ;;  %v216_v12 = vld [vmem:[%s4029_s1 + $0x620] sm:$0xff]  ;;  %v231_v14 = vld [vmem:[%s4029_s1 + $0x698] sm:$0xff]  ;;  %v257_v16 = vld [vmem:[%s4029_s1 + $0x768] sm:$0xff]  ;;  %v881_v18 = vcombine.high %v879_v10, %v879_v10  ;;  %v880_v43 = vcombine.high %v872_v34, %v872_v34 }
  0x97   :  { %2034 = vmatprep.subr.mxu0 %v233_v7  ;;  %1159 = vmatprep.subr.mxu1 %v2300_v3  ;;  %v215_v15 = vld [vmem:[%s4029_s1 + $0x618] sm:$0xff]  ;;  %v230_v19 = vld [vmem:[%s4029_s1 + $0x690] sm:$0xff]  ;;  %v365_v20 = vld [vmem:[%s4029_s1 + $0xac8] sm:$0xff] }
  0x98   :  { %2035 = vmatpush3.msra.mxu0 %v217_v8  ;;  %1160 = vmatpush2.msra.mxu1 %v259_v9  ;;  %v214_v21 = vld [vmem:[%s4029_s1 + $0x610] sm:$0xff]  ;;  %v229_v23 = vld [vmem:[%s4029_s1 + $0x688] sm:$0xff]  ;;  %v364_v26 = vld [vmem:[%s4029_s1 + $0xac0] sm:$0xff] }
  0x99   :  { %2036 = vmatprep.subr.mxu0 %v232_v11  ;;  %1161 = vmatprep.subr.mxu1 %v2300_v3  ;;  %v349_v24 = vld [vmem:[%s4029_s1 + $0xa48] sm:$0xff]  ;;  %v228_v27 = vld [vmem:[%s4029_s1 + $0x680] sm:$0xff]  ;;  %v363_v30 = vld [vmem:[%s4029_s1 + $0xab8] sm:$0xff] }
  0x9a   :  { %2037 = vmatpush3.msra.mxu0 %v216_v12  ;;  %1162 = vmatpush2.msra.mxu1 %v258_v13  ;;  %v213_v25 = vld [vmem:[%s4029_s1 + $0x608] sm:$0xff]  ;;  %v348_v28 = vld [vmem:[%s4029_s1 + $0xa40] sm:$0xff]  ;;  %v227_v31 = vld [vmem:[%s4029_s1 + $0x678] sm:$0xff] }
  0x9b   :  { %2038 = vmatprep.subr.mxu0 %v231_v14  ;;  %1163 = vmatprep.subr.mxu1 %v2300_v3  ;;  %v212_v29 = vld [vmem:[%s4029_s1 + $0x600] sm:$0xff]  ;;  %v347_v32 = vld [vmem:[%s4029_s1 + $0xa38] sm:$0xff]  ;;  %v362_v35 = vld [vmem:[%s4029_s1 + $0xab0] sm:$0xff] }
  0x9c   :  { %2039 = vmatpush3.msra.mxu0 %v215_v15  ;;  %1164 = vmatpush2.msra.mxu1 %v257_v16  ;;  %v211_v33 = vld [vmem:[%s4029_s1 + $0x5f8] sm:$0xff]  ;;  %v226_v36 = vld [vmem:[%s4029_s1 + $0x670] sm:$0xff]  ;;  %v361_v39 = vld [vmem:[%s4029_s1 + $0xaa8] sm:$0xff] }
  0x9d   :  { %2040 = vmatprep.subr.mxu0 %v230_v19  ;;  %1842 = vmatprep.mubr.msk.f32.mxu1 %vm563_vm0, %v881_v18  ;;  %v346_v37 = vld [vmem:[%s4029_s1 + $0xa30] sm:$0xff]  ;;  %v225_v41 = vld [vmem:[%s4029_s1 + $0x668] sm:$0xff]  ;;  %v360_v44 = vld [vmem:[%s4029_s1 + $0xaa0] sm:$0xff] }
  0x9e   :  { %2125 = vmatprep.subr.mxu1 %v365_v20  ;;  %2041 = vmatpush3.msra.mxu0 %v214_v21  ;;  %v210_v38 = vld [vmem:[%s4029_s1 + $0x5f0] sm:$0xff]  ;;  %v345_v42 = vld [vmem:[%s4029_s1 + $0xa28] sm:$0xff]  ;;  %v344_v45 = vld [vmem:[%s4029_s1 + $0xa20] sm:$0xff] }
  0x9f   :  { %1166 = vmatmul.mubr.f32.vlgmr.msra.gmra.mxu1 %v879_v10  ;;  %2042 = vmatprep.subr.mxu0 %v229_v23  ;;  %v209_v22 = vld [vmem:[%s4029_s1 + $0x5e8] sm:$0xff]  ;;  %v359_v47 = vld [vmem:[%s4029_s1 + $0xa98] sm:$0xff]  ;;  %v300_v50 = vld [vmem:[%s4029_s1 + $0x8c0] sm:$0xff] }
  0xa0   :  { %2126 = vmatpush3.msra.mxu1 %v349_v24  ;;  %2043 = vmatpush3.msra.mxu0 %v213_v25  ;;  %v301_v46 = vld [vmem:[%s4029_s1 + $0x8c8] sm:$0xff]  ;;  %v343_v49 = vld [vmem:[%s4029_s1 + $0xa18] sm:$0xff]  ;;  %v358_v51 = vld [vmem:[%s4029_s1 + $0xa90] sm:$0xff] }
  0xa1   :  { %2127 = vmatprep.subr.mxu1 %v364_v26  ;;  %2044 = vmatprep.subr.mxu0 %v228_v27  ;;  %v285_v48 = vld [vmem:[%s4029_s1 + $0x848] sm:$0xff]  ;;  %v284_v52 = vld [vmem:[%s4029_s1 + $0x840] sm:$0xff]  ;;  %v342_v53 = vld [vmem:[%s4029_s1 + $0xa10] sm:$0xff] }
  0xa2   :  { %2128 = vmatpush3.msra.mxu1 %v348_v28  ;;  %2045 = vmatpush3.msra.mxu0 %v212_v29  ;;  %v299_v54 = vld [vmem:[%s4029_s1 + $0x8b8] sm:$0xff]  ;;  %v357_v17 = vld [vmem:[%s4029_s1 + $0xa88] sm:$0xff]  ;;  %v298_v57 = vld [vmem:[%s4029_s1 + $0x8b0] sm:$0xff] }
  0xa3   :  { %2129 = vmatprep.subr.mxu1 %v363_v30  ;;  %2046 = vmatprep.subr.mxu0 %v227_v31  ;;  %v283_v55 = vld [vmem:[%s4029_s1 + $0x838] sm:$0xff]  ;;  %v341_v56 = vld [vmem:[%s4029_s1 + $0xa08] sm:$0xff]  ;;  %v356_v58 = vld [vmem:[%s4029_s1 + $0xa80] sm:$0xff] }
  0xa4   :  { %2130 = vmatpush3.msra.mxu1 %v347_v32  ;;  %2047 = vmatpush3.msra.mxu0 %v211_v33  ;;  %v282_v59 = vld [vmem:[%s4029_s1 + $0x830] sm:$0xff]  ;;  %v340_v60 = vld [vmem:[%s4029_s1 + $0xa00] sm:$0xff]  ;;  %v297_v61 = vld [vmem:[%s4029_s1 + $0x8a8] sm:$0xff] }
  0xa5   :  { %2131 = vmatprep.subr.mxu1 %v362_v35  ;;  %2048 = vmatprep.subr.mxu0 %v226_v36  ;;  %v355_v62 = vld [vmem:[%s4029_s1 + $0xa78] sm:$0xff]  ;;  %v281_v63 = vld [vmem:[%s4029_s1 + $0x828] sm:$0xff]  ;;  %v296_v1 = vld [vmem:[%s4029_s1 + $0x8a0] sm:$0xff] }
  0xa6   :  { %2132 = vmatpush3.msra.mxu1 %v346_v37  ;;  %2049 = vmatpush3.msra.mxu0 %v210_v38  ;;  %v339_v0 = vld [vmem:[%s4029_s1 + $0x9f8] sm:$0xff]  ;;  %v354_v2 = vld [vmem:[%s4029_s1 + $0xa70] sm:$0xff]  ;;  %v280_v4 = vld [vmem:[%s4029_s1 + $0x820] sm:$0xff] }
  0xa7   :  { %2133 = vmatprep.subr.mxu1 %v361_v39  ;;  %2050 = vmatprep.subr.mxu0 %v225_v41  ;;  %v338_v5 = vld [vmem:[%s4029_s1 + $0x9f0] sm:$0xff]  ;;  %v295_v6 = vld [vmem:[%s4029_s1 + $0x898] sm:$0xff]  ;;  %v353_v7 = vld [vmem:[%s4029_s1 + $0xa68] sm:$0xff] }
  0xa8   :  { %2134 = vmatpush3.msra.mxu1 %v345_v42  ;;  %2051 = vmatpush3.msra.mxu0 %v209_v22  ;;  %v3289_v8 = vld [vmem:[%s4028_s0 + $0x28] sm:$0xff]  ;;  %v279_v9 = vld [vmem:[%s4029_s1 + $0x818] sm:$0xff]  ;;  %v294_v11 = vld [vmem:[%s4029_s1 + $0x890] sm:$0xff] }
  0xa9   :  { %2135 = vmatprep.subr.mxu1 %v360_v44  ;;  %1095 = vmatprep.mubr.f32.mxu0 %v880_v43  ;;  %v337_v10 = vld [vmem:[%s4029_s1 + $0x9e8] sm:$0xff]  ;;  %v352_v12 = vld [vmem:[%s4029_s1 + $0xa60] sm:$0xff]  ;;  %v278_v13 = vld [vmem:[%s4029_s1 + $0x810] sm:$0xff]  ;;  %v1197_v15 = vrot.slane %v3289_v8, %v2432_v40 }
  0xaa   :  { %2136 = vmatpush3.msra.mxu1 %v344_v45  ;;  %1096 = vmatmul.mubr.f32.vlgmr.msra.gmra.mxu0 %v872_v34  ;;  %v336_v14 = vld [vmem:[%s4029_s1 + $0x9e0] sm:$0xff]  ;;  %v293_v16 = vld [vmem:[%s4029_s1 + $0x888] sm:$0xff]  ;;  %v351_v18 = vld [vmem:[%s4029_s1 + $0xa58] sm:$0xff] }
  0xab   :  { %2055 = vmatprep.subr.mxu0 %v301_v46  ;;  %2137 = vmatprep.subr.mxu1 %v359_v47  ;;  %v277_v19 = vld [vmem:[%s4029_s1 + $0x808] sm:$0xff]  ;;  %v335_v20 = vld [vmem:[%s4029_s1 + $0x9d8] sm:$0xff]  ;;  %v292_v21 = vld [vmem:[%s4029_s1 + $0x880] sm:$0xff]  ;;  %v1205_v26 = vcombine.high %v1197_v15, %v1197_v15 }
  0xac   :  { %2056 = vmatpush3.msra.mxu0 %v285_v48  ;;  %2138 = vmatpush3.msra.mxu1 %v343_v49  ;;  %v350_v23 = vld [vmem:[%s4029_s1 + $0xa50] sm:$0xff]  ;;  %v276_v24 = vld [vmem:[%s4029_s1 + $0x800] sm:$0xff]  ;;  %v291_v27 = vld [vmem:[%s4029_s1 + $0x878] sm:$0xff] }
  0xad   :  { %2057 = vmatprep.subr.mxu0 %v300_v50  ;;  %2139 = vmatprep.subr.mxu1 %v358_v51  ;;  %v334_v25 = vld [vmem:[%s4029_s1 + $0x9d0] sm:$0xff]  ;;  %v275_v29 = vld [vmem:[%s4029_s1 + $0x7f8] sm:$0xff]  ;;  %v425_v33 = vld [vmem:[%s4029_s1 + $0xca8] sm:$0xff] }
  0xae   :  { %2058 = vmatpush3.msra.mxu0 %v284_v52  ;;  %2140 = vmatpush3.msra.mxu1 %v342_v53  ;;  %v426_v28 = vld [vmem:[%s4029_s1 + $0xcb0] sm:$0xff]  ;;  %v289_v34 = vld [vmem:[%s4029_s1 + $0x868] sm:$0xff]  ;;  %v3362_v35 = vld [vmem:[%s4028_s0 + $0x20] sm:$0xff] }
  0xaf   :  { %2059 = vmatprep.subr.mxu0 %v299_v54  ;;  %2141 = vmatprep.subr.mxu1 %v357_v17  ;;  %v290_v30 = vld [vmem:[%s4029_s1 + $0x870] sm:$0xff]  ;;  %v409_v36 = vld [vmem:[%s4029_s1 + $0xc28] sm:$0xff]  ;;  %v424_v38 = vld [vmem:[%s4029_s1 + $0xca0] sm:$0xff]  ;;  %v1180_v22 = vrot.slane %v3362_v35, %v2432_v40 }
  0xb0   :  { %2060 = vmatpush3.msra.mxu0 %v283_v55  ;;  %2142 = vmatpush3.msra.mxu1 %v341_v56  ;;  %v410_v31 = vld [vmem:[%s4029_s1 + $0xc30] sm:$0xff]  ;;  %v273_v37 = vld [vmem:[%s4029_s1 + $0x7e8] sm:$0xff]  ;;  %v288_v39 = vld [vmem:[%s4029_s1 + $0x860] sm:$0xff] }
  0xb1   :  { %2061 = vmatprep.subr.mxu0 %v298_v57  ;;  %2143 = vmatprep.subr.mxu1 %v356_v58  ;;  %v274_v32 = vld [vmem:[%s4029_s1 + $0x7f0] sm:$0xff]  ;;  %v408_v41 = vld [vmem:[%s4029_s1 + $0xc20] sm:$0xff]  ;;  %v423_v43 = vld [vmem:[%s4029_s1 + $0xc98] sm:$0xff]  ;;  %v1188_v51 = vcombine.high %v1180_v22, %v1180_v22 }
  0xb2   :  { %2062 = vmatpush3.msra.mxu0 %v282_v59  ;;  %2144 = vmatpush3.msra.mxu1 %v340_v60  ;;  %v272_v42 = vld [vmem:[%s4029_s1 + $0x7e0] sm:$0xff]  ;;  %v287_v44 = vld [vmem:[%s4029_s1 + $0x858] sm:$0xff]  ;;  %v422_v47 = vld [vmem:[%s4029_s1 + $0xc90] sm:$0xff] }
  0xb3   :  { %2063 = vmatprep.subr.mxu0 %v297_v61  ;;  %2145 = vmatprep.subr.mxu1 %v355_v62  ;;  %v407_v45 = vld [vmem:[%s4029_s1 + $0xc18] sm:$0xff]  ;;  %v286_v48 = vld [vmem:[%s4029_s1 + $0x850] sm:$0xff]  ;;  %v421_v52 = vld [vmem:[%s4029_s1 + $0xc88] sm:$0xff] }
  0xb4   :  { %2064 = vmatpush3.msra.mxu0 %v281_v63  ;;  %2146 = vmatpush3.msra.mxu1 %v339_v0  ;;  %v271_v46 = vld [vmem:[%s4029_s1 + $0x7d8] sm:$0xff]  ;;  %v406_v49 = vld [vmem:[%s4029_s1 + $0xc10] sm:$0xff]  ;;  %v405_v53 = vld [vmem:[%s4029_s1 + $0xc08] sm:$0xff] }
  0xb5   :  { %2065 = vmatprep.subr.mxu0 %v296_v1  ;;  %2147 = vmatprep.subr.mxu1 %v354_v2  ;;  %v270_v50 = vld [vmem:[%s4029_s1 + $0x7d0] sm:$0xff]  ;;  %v333_v54 = vld [vmem:[%s4029_s1 + $0x9c8] sm:$0xff]  ;;  %v420_v17 = vld [vmem:[%s4029_s1 + $0xc80] sm:$0xff] }
  0xb6   :  { %2066 = vmatpush3.msra.mxu0 %v280_v4  ;;  %2148 = vmatpush3.msra.mxu1 %v338_v5  ;;  %v317_v55 = vld [vmem:[%s4029_s1 + $0x948] sm:$0xff]  ;;  %v404_v56 = vld [vmem:[%s4029_s1 + $0xc00] sm:$0xff]  ;;  %v419_v58 = vld [vmem:[%s4029_s1 + $0xc78] sm:$0xff] }
  0xb7   :  { %2067 = vmatprep.subr.mxu0 %v295_v6  ;;  %2149 = vmatprep.subr.mxu1 %v353_v7  ;;  %v332_v57 = vld [vmem:[%s4029_s1 + $0x9c0] sm:$0xff]  ;;  %v403_v60 = vld [vmem:[%s4029_s1 + $0xbf8] sm:$0xff]  ;;  %v418_v62 = vld [vmem:[%s4029_s1 + $0xc70] sm:$0xff] }
  0xb8   :  { %2068 = vmatpush3.msra.mxu0 %v279_v9  ;;  %2150 = vmatpush3.msra.mxu1 %v337_v10  ;;  %v316_v59 = vld [vmem:[%s4029_s1 + $0x940] sm:$0xff]  ;;  %v331_v61 = vld [vmem:[%s4029_s1 + $0x9b8] sm:$0xff]  ;;  %v402_v0 = vld [vmem:[%s4029_s1 + $0xbf0] sm:$0xff] }
  0xb9   :  { %2069 = vmatprep.subr.mxu0 %v294_v11  ;;  %2151 = vmatprep.subr.mxu1 %v352_v12  ;;  %v315_v63 = vld [vmem:[%s4029_s1 + $0x938] sm:$0xff]  ;;  %v330_v1 = vld [vmem:[%s4029_s1 + $0x9b0] sm:$0xff]  ;;  %v417_v2 = vld [vmem:[%s4029_s1 + $0xc68] sm:$0xff] }
  0xba   :  { %2070 = vmatpush3.msra.mxu0 %v278_v13  ;;  %2152 = vmatpush3.msra.mxu1 %v336_v14  ;;  %v314_v4 = vld [vmem:[%s4029_s1 + $0x930] sm:$0xff]  ;;  %v401_v5 = vld [vmem:[%s4029_s1 + $0xbe8] sm:$0xff]  ;;  %v416_v7 = vld [vmem:[%s4029_s1 + $0xc60] sm:$0xff] }
  0xbb   :  { %2071 = vmatprep.subr.mxu0 %v293_v16  ;;  %2153 = vmatprep.subr.mxu1 %v351_v18  ;;  %v329_v6 = vld [vmem:[%s4029_s1 + $0x9a8] sm:$0xff]  ;;  %v400_v10 = vld [vmem:[%s4029_s1 + $0xbe0] sm:$0xff]  ;;  %v415_v12 = vld [vmem:[%s4029_s1 + $0xc58] sm:$0xff] }
  0xbc   :  { %2072 = vmatpush3.msra.mxu0 %v277_v19  ;;  %2154 = vmatpush3.msra.mxu1 %v335_v20  ;;  %v313_v9 = vld [vmem:[%s4029_s1 + $0x928] sm:$0xff]  ;;  %v328_v11 = vld [vmem:[%s4029_s1 + $0x9a0] sm:$0xff]  ;;  %v399_v14 = vld [vmem:[%s4029_s1 + $0xbd8] sm:$0xff] }
  0xbd   :  { %2073 = vmatprep.subr.mxu0 %v292_v21  ;;  %2155 = vmatprep.subr.mxu1 %v350_v23  ;;  %v312_v13 = vld [vmem:[%s4029_s1 + $0x920] sm:$0xff]  ;;  %v414_v16 = vld [vmem:[%s4029_s1 + $0xc50] sm:$0xff]  ;;  %v311_v19 = vld [vmem:[%s4029_s1 + $0x918] sm:$0xff] }
  0xbe   :  { %2074 = vmatpush3.msra.mxu0 %v276_v24  ;;  %2156 = vmatpush3.msra.mxu1 %v334_v25  ;;  %v3495_v18 = vld [vmem:[%s4028_s0 + $0x30] sm:$0xff]  ;;  %v413_v23 = vld [vmem:[%s4029_s1 + $0xc48] sm:$0xff] }
  0xbf   :  { %2075 = vmatprep.subr.mxu0 %v291_v27  ;;  %1420 = vmatprep.mubr.f32.mxu1 %v1205_v26  ;;  %v398_v20 = vld [vmem:[%s4029_s1 + $0xbd0] sm:$0xff]  ;;  %v397_v25 = vld [vmem:[%s4029_s1 + $0xbc8] sm:$0xff]  ;;  %v1505_v26 = vrot.slane %v3495_v18, %v2432_v40 }
  0xc0   :  { %2160 = vmatprep.subr.mxu1 %v426_v28  ;;  %2076 = vmatpush3.msra.mxu0 %v275_v29  ;;  %v326_v21 = vld [vmem:[%s4029_s1 + $0x990] sm:$0xff]  ;;  %v325_v27 = vld [vmem:[%s4029_s1 + $0x988] sm:$0xff]  ;;  %v412_v28 = vld [vmem:[%s4029_s1 + $0xc40] sm:$0xff] }
  0xc1   :  { %1421 = vmatmul.mubr.f32.vlgmr.msra.gmra.mxu1 %v1197_v15  ;;  %2077 = vmatprep.subr.mxu0 %v290_v30  ;;  %v327_v15 = vld [vmem:[%s4029_s1 + $0x998] sm:$0xff]  ;;  %v310_v24 = vld [vmem:[%s4029_s1 + $0x910] sm:$0xff]  ;;  %v309_v29 = vld [vmem:[%s4029_s1 + $0x908] sm:$0xff] }
  0xc2   :  { %2161 = vmatpush3.msra.mxu1 %v410_v31  ;;  %2078 = vmatpush3.msra.mxu0 %v274_v32  ;;  %v396_v30 = vld [vmem:[%s4029_s1 + $0xbc0] sm:$0xff]  ;;  %v411_v32 = vld [vmem:[%s4029_s1 + $0xc38] sm:$0xff] }
  0xc3   :  { %2162 = vmatprep.subr.mxu1 %v425_v33  ;;  %2079 = vmatprep.subr.mxu0 %v289_v34  ;;  %v324_v31 = vld [vmem:[%s4029_s1 + $0x980] sm:$0xff]  ;;  %v395_v34 = vld [vmem:[%s4029_s1 + $0xbb8] sm:$0xff] }
  0xc4   :  { %2163 = vmatpush3.msra.mxu1 %v409_v36  ;;  %2080 = vmatpush3.msra.mxu0 %v273_v37  ;;  %v308_v33 = vld [vmem:[%s4029_s1 + $0x900] sm:$0xff]  ;;  %v1513_v36 = vcombine.high %v1505_v26, %v1505_v26  ;;  %v323_v37 = vld [vmem:[%s4029_s1 + $0x978] sm:$0xff] }
  0xc5   :  { %2164 = vmatprep.subr.mxu1 %v424_v38  ;;  %2081 = vmatprep.subr.mxu0 %v288_v39  ;;  %v458_v38 = vld [vmem:[%s4029_s1 + $0xdb0] sm:$0xff]  ;;  %v307_v39 = vld [vmem:[%s4029_s1 + $0x8f8] sm:$0xff] }
  0xc6   :  { %2165 = vmatpush3.msra.mxu1 %v408_v41  ;;  %2082 = vmatpush3.msra.mxu0 %v272_v42  ;;  %v322_v41 = vld [vmem:[%s4029_s1 + $0x970] sm:$0xff] }
  0xc7   :  { %2166 = vmatprep.subr.mxu1 %v423_v43  ;;  %2083 = vmatprep.subr.mxu0 %v287_v44  ;;  %v442_v42 = vld [vmem:[%s4029_s1 + $0xd30] sm:$0xff]  ;;  %v1173_v43 = vcombine.high %v3362_v35, %v3362_v35  ;;  %v457_v44 = vld [vmem:[%s4029_s1 + $0xda8] sm:$0xff] }
  0xc8   :  { %2167 = vmatpush3.msra.mxu1 %v407_v45  ;;  %2084 = vmatpush3.msra.mxu0 %v271_v46  ;;  %v321_v45 = vld [vmem:[%s4029_s1 + $0x968] sm:$0xff] }
  0xc9   :  { %2168 = vmatprep.subr.mxu1 %v422_v47  ;;  %2085 = vmatprep.subr.mxu0 %v286_v48  ;;  %v441_v46 = vld [vmem:[%s4029_s1 + $0xd28] sm:$0xff]  ;;  %v456_v47 = vld [vmem:[%s4029_s1 + $0xda0] sm:$0xff] }
  0xca   :  { %2169 = vmatpush3.msra.mxu1 %v406_v49  ;;  %2086 = vmatpush3.msra.mxu0 %v270_v50  ;;  %v305_v35 = vld [vmem:[%s4029_s1 + $0x8e8] sm:$0xff]  ;;  %v320_v48 = vld [vmem:[%s4029_s1 + $0x960] sm:$0xff] }
  0xcb   :  { %2170 = vmatprep.subr.mxu1 %v421_v52  ;;  %1280 = vmatprep.mubr.f32.mxu0 %v1188_v51  ;;  %v440_v49 = vld [vmem:[%s4029_s1 + $0xd20] sm:$0xff]  ;;  %v1187_v51 = vrot.slane %v1173_v43, %v2432_v40  ;;  %v455_v52 = vld [vmem:[%s4029_s1 + $0xd98] sm:$0xff] }
  0xcc   :  { %2171 = vmatpush3.msra.mxu1 %v405_v53  ;;  %1281 = vmatmul.mubr.f32.vlgmr.msra.gmra.mxu0 %v1180_v22  ;;  %v306_v22 = vld [vmem:[%s4029_s1 + $0x8f0] sm:$0xff]  ;;  %v304_v50 = vld [vmem:[%s4029_s1 + $0x8e0] sm:$0xff]  ;;  %v319_v53 = vld [vmem:[%s4029_s1 + $0x958] sm:$0xff] }
  0xcd   :  { %2090 = vmatprep.subr.mxu0 %v333_v54  ;;  %2172 = vmatprep.subr.mxu1 %v420_v17  ;;  %v439_v54 = vld [vmem:[%s4029_s1 + $0xd18] sm:$0xff]  ;;  %v368_v43 = vld [vmem:[%s4029_s1 + $0xae0] sm:$0xff] }
  0xce   :  { %2091 = vmatpush3.msra.mxu0 %v317_v55  ;;  %2173 = vmatpush3.msra.mxu1 %v404_v56  ;;  %v303_v17 = vld [vmem:[%s4029_s1 + $0x8d8] sm:$0xff]  ;;  %v454_v55 = vld [vmem:[%s4029_s1 + $0xd90] sm:$0xff] }
  0xcf   :  { %2092 = vmatprep.subr.mxu0 %v332_v57  ;;  %2174 = vmatprep.subr.mxu1 %v419_v58  ;;  %v318_v56 = vld [vmem:[%s4029_s1 + $0x950] sm:$0xff] }
  0xd0   :  { %2093 = vmatpush3.msra.mxu0 %v316_v59  ;;  %2175 = vmatpush3.msra.mxu1 %v403_v60  ;;  %v438_v57 = vld [vmem:[%s4029_s1 + $0xd10] sm:$0xff]  ;;  %v1189_v59 = vcombine.high %v1187_v51, %v1187_v51  ;;  %v453_v60 = vld [vmem:[%s4029_s1 + $0xd88] sm:$0xff] }
  0xd1   :  { %2094 = vmatprep.subr.mxu0 %v331_v61  ;;  %2176 = vmatprep.subr.mxu1 %v418_v62  ;;  %v302_v58 = vld [vmem:[%s4029_s1 + $0x8d0] sm:$0xff]  ;;  %v437_v61 = vld [vmem:[%s4029_s1 + $0xd08] sm:$0xff]  ;;  %v452_v62 = vld [vmem:[%s4029_s1 + $0xd80] sm:$0xff] }
  0xd2   :  { %2095 = vmatpush3.msra.mxu0 %v315_v63  ;;  %2177 = vmatpush3.msra.mxu1 %v402_v0  ;;  %v381_v63 = vld [vmem:[%s4029_s1 + $0xb48] sm:$0xff]  ;;  %v436_v0 = vld [vmem:[%s4029_s1 + $0xd00] sm:$0xff] }
  0xd3   :  { %2096 = vmatprep.subr.mxu0 %v330_v1  ;;  %2178 = vmatprep.subr.mxu1 %v417_v2  ;;  %v451_v1 = vld [vmem:[%s4029_s1 + $0xd78] sm:$0xff]  ;;  %v380_v2 = vld [vmem:[%s4029_s1 + $0xb40] sm:$0xff] }
  0xd4   :  { %2097 = vmatpush3.msra.mxu0 %v314_v4  ;;  %2179 = vmatpush3.msra.mxu1 %v401_v5  ;;  %v435_v4 = vld [vmem:[%s4029_s1 + $0xcf8] sm:$0xff]  ;;  %v450_v5 = vld [vmem:[%s4029_s1 + $0xd70] sm:$0xff] }
  0xd5   :  { %2098 = vmatprep.subr.mxu0 %v329_v6  ;;  %2180 = vmatprep.subr.mxu1 %v416_v7  ;;  %v379_v6 = vld [vmem:[%s4029_s1 + $0xb38] sm:$0xff]  ;;  %v434_v7 = vld [vmem:[%s4029_s1 + $0xcf0] sm:$0xff] }
  0xd6   :  { %2099 = vmatpush3.msra.mxu0 %v313_v9  ;;  %2181 = vmatpush3.msra.mxu1 %v400_v10  ;;  %v449_v9 = vld [vmem:[%s4029_s1 + $0xd68] sm:$0xff]  ;;  %v378_v10 = vld [vmem:[%s4029_s1 + $0xb30] sm:$0xff] }
  0xd7   :  { %2100 = vmatprep.subr.mxu0 %v328_v11  ;;  %2182 = vmatprep.subr.mxu1 %v415_v12  ;;  %v433_v11 = vld [vmem:[%s4029_s1 + $0xce8] sm:$0xff]  ;;  %v448_v12 = vld [vmem:[%s4029_s1 + $0xd60] sm:$0xff] }
  0xd8   :  { %2101 = vmatpush3.msra.mxu0 %v312_v13  ;;  %2183 = vmatpush3.msra.mxu1 %v399_v14  ;;  %v377_v13 = vld [vmem:[%s4029_s1 + $0xb28] sm:$0xff]  ;;  %v432_v14 = vld [vmem:[%s4029_s1 + $0xce0] sm:$0xff] }
  0xd9   :  { %2102 = vmatprep.subr.mxu0 %v327_v15  ;;  %2184 = vmatprep.subr.mxu1 %v414_v16  ;;  %v447_v15 = vld [vmem:[%s4029_s1 + $0xd58] sm:$0xff]  ;;  %v376_v16 = vld [vmem:[%s4029_s1 + $0xb20] sm:$0xff] }
  0xda   :  { %2103 = vmatpush3.msra.mxu0 %v311_v19  ;;  %2185 = vmatpush3.msra.mxu1 %v398_v20  ;;  %v431_v19 = vld [vmem:[%s4029_s1 + $0xcd8] sm:$0xff]  ;;  %v1498_v20 = vcombine.high %v3495_v18, %v3495_v18  ;;  %v445_v18 = vld [vmem:[%s4029_s1 + $0xd48] sm:$0xff] }
  0xdb   :  { %2104 = vmatprep.subr.mxu0 %v326_v21  ;;  %2186 = vmatprep.subr.mxu1 %v413_v23  ;;  %v446_v21 = vld [vmem:[%s4029_s1 + $0xd50] sm:$0xff]  ;;  %v375_v23 = vld [vmem:[%s4029_s1 + $0xb18] sm:$0xff] }
  0xdc   :  { %2105 = vmatpush3.msra.mxu0 %v310_v24  ;;  %2187 = vmatpush3.msra.mxu1 %v397_v25  ;;  %v430_v24 = vld [vmem:[%s4029_s1 + $0xcd0] sm:$0xff] }
  0xdd   :  { %2106 = vmatprep.subr.mxu0 %v325_v27  ;;  %2188 = vmatprep.subr.mxu1 %v412_v28  ;;  %v374_v25 = vld [vmem:[%s4029_s1 + $0xb10] sm:$0xff]  ;;  %v1512_v27 = vrot.slane %v1498_v20, %v2432_v40  ;;  %v444_v28 = vld [vmem:[%s4029_s1 + $0xd40] sm:$0xff] }
  0xde   :  { %2107 = vmatpush3.msra.mxu0 %v309_v29  ;;  %2189 = vmatpush3.msra.mxu1 %v396_v30  ;;  %v373_v29 = vld [vmem:[%s4029_s1 + $0xb08] sm:$0xff]  ;;  %v428_v30 = vld [vmem:[%s4029_s1 + $0xcc0] sm:$0xff]  ;;  %v474_v20 = vld [vmem:[%s4029_s1 + $0xe30] sm:$0xff] }
  0xdf   :  { %2108 = vmatprep.subr.mxu0 %v324_v31  ;;  %2190 = vmatprep.subr.mxu1 %v411_v32  ;;  %v443_v31 = vld [vmem:[%s4029_s1 + $0xd38] sm:$0xff]  ;;  %v372_v32 = vld [vmem:[%s4029_s1 + $0xb00] sm:$0xff] }
  0xe0   :  { %2109 = vmatpush3.msra.mxu0 %v308_v33  ;;  %2191 = vmatpush3.msra.mxu1 %v395_v34  ;;  %v427_v33 = vld [vmem:[%s4029_s1 + $0xcb8] sm:$0xff]  ;;  %v1514_v34 = vcombine.high %v1512_v27, %v1512_v27 }
  0xe1   :  { %2110 = vmatprep.subr.mxu0 %v323_v37  ;;  %1605 = vmatprep.mubr.f32.mxu1 %v1513_v36  ;;  %v371_v37 = vld [vmem:[%s4029_s1 + $0xaf8] sm:$0xff] }
  0xe2   :  { %2195 = vmatprep.subr.mxu1 %v458_v38  ;;  %2111 = vmatpush3.msra.mxu0 %v307_v39  ;;  %v370_v39 = vld [vmem:[%s4029_s1 + $0xaf0] sm:$0xff] }
  0xe3   :  { %1606 = vmatmul.mubr.f32.vlgmr.msra.gmra.mxu1 %v1505_v26  ;;  %2112 = vmatprep.subr.mxu0 %v322_v41  ;;  %v429_v26 = vld [vmem:[%s4029_s1 + $0xcc8] sm:$0xff]  ;;  %v506_v41 = vld [vmem:[%s4029_s1 + $0xf30] sm:$0xff] }
  0xe4   :  { %2196 = vmatpush3.msra.mxu1 %v442_v42  ;;  %2113 = vmatpush3.msra.mxu0 %v306_v22  ;;  %v369_v42 = vld [vmem:[%s4029_s1 + $0xae8] sm:$0xff] }
  0xe5   :  { %2197 = vmatprep.subr.mxu1 %v457_v44  ;;  %2114 = vmatprep.subr.mxu0 %v321_v45  ;;  %v505_v22 = vld [vmem:[%s4029_s1 + $0xf28] sm:$0xff]  ;;  %v504_v44 = vld [vmem:[%s4029_s1 + $0xf20] sm:$0xff]  ;;  %v367_v45 = vld [vmem:[%s4029_s1 + $0xad8] sm:$0xff] }
  0xe6   :  { %2198 = vmatpush3.msra.mxu1 %v441_v46  ;;  %2115 = vmatpush3.msra.mxu0 %v305_v35  ;;  %v503_v46 = vld [vmem:[%s4029_s1 + $0xf18] sm:$0xff]  ;;  %v366_v35 = vld [vmem:[%s4029_s1 + $0xad0] sm:$0xff] }
  0xe7   :  { %2199 = vmatprep.subr.mxu1 %v456_v47  ;;  %2116 = vmatprep.subr.mxu0 %v320_v48  ;;  %v502_v47 = vld [vmem:[%s4029_s1 + $0xf10] sm:$0xff] }
  0xe8   :  { %2200 = vmatpush3.msra.mxu1 %v440_v49  ;;  %2117 = vmatpush3.msra.mxu0 %v304_v50  ;;  %v394_v48 = vld [vmem:[%s4029_s1 + $0xbb0] sm:$0xff]  ;;  %v501_v49 = vld [vmem:[%s4029_s1 + $0xf08] sm:$0xff]  ;;  %v1190_v50 = vcombine.high %v3289_v8, %v3289_v8  ;;  %v392_v8 = vld [vmem:[%s4029_s1 + $0xba0] sm:$0xff] }
  0xe9   :  { %2201 = vmatprep.subr.mxu1 %v455_v52  ;;  %2118 = vmatprep.subr.mxu0 %v319_v53  ;;  %v500_v52 = vld [vmem:[%s4029_s1 + $0xf00] sm:$0xff]  ;;  %v499_v53 = vld [vmem:[%s4029_s1 + $0xef8] sm:$0xff] }
  0xea   :  { %2202 = vmatpush3.msra.mxu1 %v439_v54  ;;  %2119 = vmatpush3.msra.mxu0 %v303_v17  ;;  %v3790_v54 = vrot.slane %v1190_v50, %v2432_v40  ;;  %v391_v17 = vld [vmem:[%s4029_s1 + $0xb98] sm:$0xff] }
  0xeb   :  { %2203 = vmatprep.subr.mxu1 %v454_v55  ;;  %2120 = vmatprep.subr.mxu0 %v318_v56  ;;  %v498_v55 = vld [vmem:[%s4029_s1 + $0xef0] sm:$0xff]  ;;  %v467_v50 = vld [vmem:[%s4029_s1 + $0xdf8] sm:$0xff] }
  0xec   :  { %2204 = vmatpush3.msra.mxu1 %v438_v57  ;;  %2121 = vmatpush3.msra.mxu0 %v302_v58  ;;  %v390_v56 = vld [vmem:[%s4029_s1 + $0xb90] sm:$0xff]  ;;  %v497_v57 = vld [vmem:[%s4029_s1 + $0xee8] sm:$0xff]  ;;  %v1206_v58 = vcombine.high %v3790_v54, %v3790_v54 }
  0xed   :  { %2205 = vmatprep.subr.mxu1 %v453_v60  ;;  %1350 = vmatprep.mubr.f32.mxu0 %v1189_v59  ;;  %v389_v59 = vld [vmem:[%s4029_s1 + $0xb88] sm:$0xff]  ;;  %v496_v60 = vld [vmem:[%s4029_s1 + $0xee0] sm:$0xff] }
  0xee   :  { %2206 = vmatpush3.msra.mxu1 %v437_v61  ;;  %1351 = vmatmul.mubr.f32.vlgmr.msra.gmra.mxu0 %v1187_v51  ;;  %v393_v51 = vld [vmem:[%s4029_s1 + $0xba8] sm:$0xff]  ;;  %v1877_v61 = vpop.f32.mrf.mxu0 }
  0xef   :  { %1426 = vmatprep.subr.mxu0 %v2300_v3  ;;  %2207 = vmatprep.subr.mxu1 %v452_v62  ;;  %v388_v62 = vld [vmem:[%s4029_s1 + $0xb80] sm:$0xff] }
  0xf0   :  { %1427 = vmatpush1.msra.mxu0 %v381_v63  ;;  %2208 = vmatpush3.msra.mxu1 %v436_v0  ;;  %v495_v63 = vld [vmem:[%s4029_s1 + $0xed8] sm:$0xff] }
  0xf1   :  { %1428 = vmatprep.subr.mxu0 %v2300_v3  ;;  %2209 = vmatprep.subr.mxu1 %v451_v1  ;;  %v387_v0 = vld [vmem:[%s4029_s1 + $0xb78] sm:$0xff]  ;;  %v494_v1 = vld [vmem:[%s4029_s1 + $0xed0] sm:$0xff] }
  0xf2   :  { %1429 = vmatpush1.msra.mxu0 %v380_v2  ;;  %2210 = vmatpush3.msra.mxu1 %v435_v4  ;;  %v1878_v2 = vpop.f32.mrf.mxu0  ;;  %v386_v4 = vld [vmem:[%s4029_s1 + $0xb70] sm:$0xff] }
  0xf3   :  { %1430 = vmatprep.subr.mxu0 %v2300_v3  ;;  %2211 = vmatprep.subr.mxu1 %v450_v5  ;;  %v493_v5 = vld [vmem:[%s4029_s1 + $0xec8] sm:$0xff] }
  0xf4   :  { %1431 = vmatpush1.msra.mxu0 %v379_v6  ;;  %2212 = vmatpush3.msra.mxu1 %v434_v7  ;;  %v385_v7 = vld [vmem:[%s4029_s1 + $0xb68] sm:$0xff] }
  0xf5   :  { %1432 = vmatprep.subr.mxu0 %v2300_v3  ;;  %2213 = vmatprep.subr.mxu1 %v449_v9  ;;  %v492_v9 = vld [vmem:[%s4029_s1 + $0xec0] sm:$0xff] }
  0xf6   :  { %1433 = vmatpush1.msra.mxu0 %v378_v10  ;;  %2214 = vmatpush3.msra.mxu1 %v433_v11  ;;  %v384_v10 = vld [vmem:[%s4029_s1 + $0xb60] sm:$0xff]  ;;  %v491_v11 = vld [vmem:[%s4029_s1 + $0xeb8] sm:$0xff] }
  0xf7   :  { %1434 = vmatprep.subr.mxu0 %v2300_v3  ;;  %2215 = vmatprep.subr.mxu1 %v448_v12 }
  0xf8   :  { %1435 = vmatpush1.msra.mxu0 %v377_v13  ;;  %2216 = vmatpush3.msra.mxu1 %v432_v14  ;;  %v383_v13 = vld [vmem:[%s4029_s1 + $0xb58] sm:$0xff] }
  0xf9   :  { %1436 = vmatprep.subr.mxu0 %v2300_v3  ;;  %2217 = vmatprep.subr.mxu1 %v447_v15  ;;  %v519_v14 = vld [vmem:[%s4029_s1 + $0xf98] sm:$0xff]  ;;  %v382_v15 = vld [vmem:[%s4029_s1 + $0xb50] sm:$0xff] }
  0xfa   :  { %1437 = vmatpush1.msra.mxu0 %v376_v16  ;;  %2218 = vmatpush3.msra.mxu1 %v431_v19  ;;  %v490_v19 = vld [vmem:[%s4029_s1 + $0xeb0] sm:$0xff] }
  0xfb   :  { %1438 = vmatprep.subr.mxu0 %v2300_v3  ;;  %2219 = vmatprep.subr.mxu1 %v446_v21 }
  0xfc   :  { %1439 = vmatpush1.msra.mxu0 %v375_v23  ;;  %2220 = vmatpush3.msra.mxu1 %v430_v24  ;;  %v518_v23 = vld [vmem:[%s4029_s1 + $0xf90] sm:$0xff]  ;;  %v1879_v24 = vadd.f32 %v1878_v2, %v1877_v61  ;;  %v479_v61 = vld [vmem:[%s4029_s1 + $0xe58] sm:$0xff] }
  0xfd   :  { %1440 = vmatprep.subr.mxu0 %v2300_v3  ;;  %2221 = vmatprep.subr.mxu1 %v445_v18  ;;  %v489_v18 = vld [vmem:[%s4029_s1 + $0xea8] sm:$0xff]  ;;  %v462_v2 = vld [vmem:[%s4029_s1 + $0xdd0] sm:$0xff] }
  0xfe   :  { %1441 = vmatpush1.msra.mxu0 %v374_v25  ;;  %2222 = vmatpush3.msra.mxu1 %v429_v26  ;;  %v473_v25 = vld [vmem:[%s4029_s1 + $0xe28] sm:$0xff] }
  0xff   :  { %1442 = vmatprep.subr.mxu0 %v2300_v3  ;;  %2223 = vmatprep.subr.mxu1 %v444_v28  ;;  %v3718_v36 = vpop.f32.mrf.mxu1 }
 0x100   :  { %1443 = vmatpush1.msra.mxu0 %v373_v29  ;;  %2224 = vmatpush3.msra.mxu1 %v428_v30  ;;  %v488_v29 = vld [vmem:[%s4029_s1 + $0xea0] sm:$0xff] }
 0x101   :  { %1444 = vmatprep.subr.mxu0 %v2300_v3  ;;  %2225 = vmatprep.subr.mxu1 %v443_v31  ;;  %v844_v38 = vpop.f32.mrf.mxu1  ;;  %v472_v31 = vld [vmem:[%s4029_s1 + $0xe20] sm:$0xff] }
 0x102   :  { %1445 = vmatpush1.msra.mxu0 %v372_v32  ;;  %2226 = vmatpush3.msra.mxu1 %v427_v33  ;;  %v516_v32 = vld [vmem:[%s4029_s1 + $0xf80] sm:$0xff]  ;;  %v487_v33 = vld [vmem:[%s4029_s1 + $0xe98] sm:$0xff] }
 0x103   :  { %1675 = vmatprep.mubr.f32.mxu1 %v1514_v34  ;;  %1446 = vmatprep.subr.mxu0 %v2300_v3  ;;  %v515_v38 = vld [vmem:[%s4029_s1 + $0xf78] sm:$0xff] }
 0x104   :  { %1676 = vmatmul.mubr.f32.vlgmr.msra.gmra.mxu1 %v1512_v27  ;;  %1447 = vmatpush1.msra.mxu0 %v371_v37  ;;  %v517_v27 = vld [vmem:[%s4029_s1 + $0xf88] sm:$0xff]  ;;  %v471_v37 = vld [vmem:[%s4029_s1 + $0xe18] sm:$0xff] }
 0x105   :  { %1448 = vmatprep.subr.mxu0 %v2300_v3  ;;  %1751 = vmatprep.subr.mxu1 %v2300_v3  ;;  %v1912_v6 = vpop.f32.mrf.mxu0 }
 0x106   :  { %1449 = vmatpush1.msra.mxu0 %v370_v39  ;;  %1752 = vmatpush1.msra.mxu1 %v506_v41  ;;  %v486_v41 = vld [vmem:[%s4029_s1 + $0xe90] sm:$0xff] }
 0x107   :  { %1450 = vmatprep.subr.mxu0 %v2300_v3  ;;  %1753 = vmatprep.subr.mxu1 %v2300_v3  ;;  %v1913_v12 = vpop.f32.mrf.mxu0 }
 0x108   :  { %1451 = vmatpush1.msra.mxu0 %v369_v42  ;;  %1754 = vmatpush1.msra.mxu1 %v505_v22  ;;  %v1914_v16 = vadd.f32 %v1913_v12, %v1912_v6  ;;  %v470_v42 = vld [vmem:[%s4029_s1 + $0xe10] sm:$0xff]  ;;  %v476_v6 = vld [vmem:[%s4029_s1 + $0xe40] sm:$0xff] }
 0x109   :  { %1452 = vmatprep.subr.mxu0 %v2300_v3  ;;  %1755 = vmatprep.subr.mxu1 %v2300_v3  ;;  %v514_v22 = vld [vmem:[%s4029_s1 + $0xf70] sm:$0xff] }
 0x10a   :  { %1453 = vmatpush1.msra.mxu0 %v368_v43  ;;  %1756 = vmatpush1.msra.mxu1 %v504_v44  ;;  %v703_v28 = vadd.f32 %v1914_v16, %v1879_v24  ;;  %v469_v43 = vld [vmem:[%s4029_s1 + $0xe08] sm:$0xff] }
 0x10b   :  { %1454 = vmatprep.subr.mxu0 %v2300_v3  ;;  %1757 = vmatprep.subr.mxu1 %v2300_v3  ;;  %v513_v44 = vld [vmem:[%s4029_s1 + $0xf68] sm:$0xff] }
 0x10c   :  { %1455 = vmatpush1.msra.mxu0 %v367_v45  ;;  %1758 = vmatpush1.msra.mxu1 %v503_v46  ;;  %v19_v45 = vld [vmem:[%s4028_s0 + $0x38] sm:$0xff]  ;;  %v484_v46 = vld [vmem:[%s4029_s1 + $0xe80] sm:$0xff] }
 0x10d   :  { %1456 = vmatprep.subr.mxu0 %v2300_v3  ;;  %1759 = vmatprep.subr.mxu1 %v2300_v3 }
 0x10e   :  { %1457 = vmatpush1.msra.mxu0 %v366_v35  ;;  %1760 = vmatpush1.msra.mxu1 %v502_v47  ;;  %v468_v35 = vld [vmem:[%s4029_s1 + $0xe00] sm:$0xff] }
 0x10f   :  { %1464 = vmatprep.subr.mxu0 %v2300_v3  ;;  %1761 = vmatprep.subr.mxu1 %v2300_v3  ;;  %v512_v47 = vld [vmem:[%s4029_s1 + $0xf60] sm:$0xff] }
 0x110   :  { %1465 = vmatpush2.msra.mxu0 %v394_v48  ;;  %1762 = vmatpush1.msra.mxu1 %v501_v49  ;;  %v483_v48 = vld [vmem:[%s4029_s1 + $0xe78] sm:$0xff]  ;;  %v1522_v49 = vrot.slane %v19_v45, %v2432_v40 }
 0x111   :  { %1466 = vmatprep.subr.mxu0 %v2300_v3  ;;  %1763 = vmatprep.subr.mxu1 %v2300_v3 }
 0x112   :  { %1467 = vmatpush2.msra.mxu0 %v393_v51  ;;  %1764 = vmatpush1.msra.mxu1 %v500_v52  ;;  %v511_v51 = vld [vmem:[%s4029_s1 + $0xf58] sm:$0xff]  ;;  %v482_v52 = vld [vmem:[%s4029_s1 + $0xe70] sm:$0xff] }
 0x113   :  { %1468 = vmatprep.subr.mxu0 %v2300_v3  ;;  %1765 = vmatprep.subr.mxu1 %v2300_v3 }
 0x114   :  { %1469 = vmatpush2.msra.mxu0 %v392_v8  ;;  %1766 = vmatpush1.msra.mxu1 %v499_v53  ;;  %v1515_v8 = vcombine.high %v19_v45, %v19_v45  ;;  %v466_v53 = vld [vmem:[%s4029_s1 + $0xdf0] sm:$0xff] }
 0x115   :  { %1470 = vmatprep.subr.mxu0 %v2300_v3  ;;  %1767 = vmatprep.subr.mxu1 %v2300_v3 }
 0x116   :  { %1471 = vmatpush2.msra.mxu0 %v391_v17  ;;  %1768 = vmatpush1.msra.mxu1 %v498_v55  ;;  %v481_v17 = vld [vmem:[%s4029_s1 + $0xe68] sm:$0xff]  ;;  %v1530_v55 = vcombine.high %v1522_v49, %v1522_v49 }
 0x117   :  { %1472 = vmatprep.subr.mxu0 %v2300_v3  ;;  %1769 = vmatprep.subr.mxu1 %v2300_v3 }
 0x118   :  { %1473 = vmatpush2.msra.mxu0 %v390_v56  ;;  %1770 = vmatpush1.msra.mxu1 %v497_v57  ;;  %v465_v56 = vld [vmem:[%s4029_s1 + $0xde8] sm:$0xff]  ;;  %v480_v57 = vld [vmem:[%s4029_s1 + $0xe60] sm:$0xff] }
 0x119   :  { %1474 = vmatprep.subr.mxu0 %v2300_v3  ;;  %1771 = vmatprep.subr.mxu1 %v2300_v3 }
 0x11a   :  { %1475 = vmatpush2.msra.mxu0 %v389_v59  ;;  %1843 = vmatprep.mubr.msk.f32.mxu0 %vm563_vm0, %v1206_v58  ;;  %v509_v58 = vld [vmem:[%s4029_s1 + $0xf48] sm:$0xff]  ;;  %v1529_v59 = vrot.slane %v1515_v8, %v2432_v40  ;;  %v463_v40 = vld [vmem:[%s4029_s1 + $0xdd8] sm:$0xff] }
 0x11b   :  { %1476 = vmatprep.subr.mxu0 %v2300_v3  ;;  %1772 = vmatpush1.msra.mxu1 %v496_v60  ;;  %v464_v60 = vld [vmem:[%s4029_s1 + $0xde0] sm:$0xff] }
 0x11c   :  { %1477 = vmatpush2.msra.mxu0 %v388_v62  ;;  %1773 = vmatprep.subr.mxu1 %v2300_v3  ;;  %v508_v62 = vld [vmem:[%s4029_s1 + $0xf40] sm:$0xff] }
 0x11d   :  { %1478 = vmatprep.subr.mxu0 %v2300_v3  ;;  %1774 = vmatpush1.msra.mxu1 %v495_v63  ;;  %v478_v63 = vld [vmem:[%s4029_s1 + $0xe50] sm:$0xff] }
 0x11e   :  { %1479 = vmatpush2.msra.mxu0 %v387_v0  ;;  %1775 = vmatprep.subr.mxu1 %v2300_v3  ;;  %v507_v0 = vld [vmem:[%s4029_s1 + $0xf38] sm:$0xff] }
 0x11f   :  { %1480 = vmatprep.subr.mxu0 %v2300_v3  ;;  %1776 = vmatpush1.msra.mxu1 %v494_v1  ;;  %v1531_v1 = vcombine.high %v1529_v59, %v1529_v59 }
 0x120   :  { %1481 = vmatpush2.msra.mxu0 %v386_v4  ;;  %1777 = vmatprep.subr.mxu1 %v2300_v3  ;;  %v477_v4 = vld [vmem:[%s4029_s1 + $0xe48] sm:$0xff] }
 0x121   :  { %1482 = vmatprep.subr.mxu0 %v2300_v3  ;;  %1778 = vmatpush1.msra.mxu1 %v493_v5  ;;  %v461_v5 = vld [vmem:[%s4029_s1 + $0xdc8] sm:$0xff] }
 0x122   :  { %1483 = vmatpush2.msra.mxu0 %v385_v7  ;;  %1779 = vmatprep.subr.mxu1 %v2300_v3  ;;  %v460_v7 = vld [vmem:[%s4029_s1 + $0xdc0] sm:$0xff] }
 0x123   :  { %1484 = vmatprep.subr.mxu0 %v2300_v3  ;;  %1780 = vmatpush1.msra.mxu1 %v492_v9  ;;  %v459_v9 = vld [vmem:[%s4029_s1 + $0xdb8] sm:$0xff] }
 0x124   :  { %1485 = vmatpush2.msra.mxu0 %v384_v10  ;;  %1781 = vmatprep.subr.mxu1 %v2300_v3  ;;  %v2017_v10 = vpop.f32.mrf.mxu1 }
 0x125   :  { %1486 = vmatprep.subr.mxu0 %v2300_v3  ;;  %1782 = vmatpush1.msra.mxu1 %v491_v11 }
 0x126   :  { %1487 = vmatpush2.msra.mxu0 %v383_v13  ;;  %1789 = vmatprep.subr.mxu1 %v2300_v3  ;;  %v2018_v11 = vpop.f32.mrf.mxu1 }
 0x127   :  { %1488 = vmatprep.subr.mxu0 %v2300_v3  ;;  %v1947_v21 = vpop.f32.mrf.mxu0  ;;  %1790 = vmatpush2.msra.mxu1 %v519_v14 }
 0x128   :  { %1489 = vmatpush2.msra.mxu0 %v382_v15  ;;  %1791 = vmatprep.subr.mxu1 %v2300_v3 }
 0x129   :  { %1491 = vmatmul.mubr.f32.vlgmr.msra.gmra.mxu0 %v3790_v54  ;;  %2230 = vmatprep.subr.mxu0 %v490_v19  ;;  %v1948_v26 = vpop.f32.mrf.mxu0  ;;  %v510_v54 = vld [vmem:[%s4029_s1 + $0xf50] sm:$0xff] }
 0x12a   :  { %2231 = vmatpush3.msra.mxu0 %v474_v20  ;;  %v1949_v30 = vadd.f32 %v1948_v26, %v1947_v21  ;;  %1792 = vmatpush2.msra.mxu1 %v518_v23  ;;  %v2019_v20 = vadd.f32 %v2018_v11, %v2017_v10 }
 0x12b   :  { %2232 = vmatprep.subr.mxu0 %v489_v18  ;;  %1793 = vmatprep.subr.mxu1 %v2300_v3 }
 0x12c   :  { %2233 = vmatpush3.msra.mxu0 %v473_v25  ;;  %v773_v34 = vadd.f32 %v1949_v30, %v703_v28  ;;  %1794 = vmatpush2.msra.mxu1 %v517_v27 }
 0x12d   :  { %2234 = vmatprep.subr.mxu0 %v488_v29  ;;  %1795 = vmatprep.subr.mxu1 %v2300_v3 }
 0x12e   :  { %2235 = vmatpush3.msra.mxu0 %v472_v31  ;;  %v843_v39 = vadd.f32 %v3718_v36, %v773_v34  ;;  %1796 = vmatpush2.msra.mxu1 %v516_v32  ;;  %v485_v36 = vld [vmem:[%s4029_s1 + $0xe88] sm:$0xff] }
 0x12f   :  { %2236 = vmatprep.subr.mxu0 %v487_v33  ;;  %1797 = vmatprep.subr.mxu1 %v2300_v3 }
 0x130   :  { %2237 = vmatpush3.msra.mxu0 %v471_v37  ;;  %1821 = vst [vmem:[#allocation2] sm:$0x3] %v843_v39  ;;  %1798 = vmatpush2.msra.mxu1 %v515_v38 }
 0x131   :  { %2238 = vmatprep.subr.mxu0 %v486_v41  ;;  %1799 = vmatprep.subr.mxu1 %v2300_v3 }
 0x132   :  { %2239 = vmatpush3.msra.mxu0 %v470_v42  ;;  %1800 = vmatpush2.msra.mxu1 %v514_v22 }
 0x133   :  { %2240 = vmatprep.subr.mxu0 %v485_v36  ;;  %1801 = vmatprep.subr.mxu1 %v2300_v3 }
 0x134   :  { %2241 = vmatpush3.msra.mxu0 %v469_v43  ;;  %1802 = vmatpush2.msra.mxu1 %v513_v44 }
 0x135   :  { %2242 = vmatprep.subr.mxu0 %v484_v46  ;;  %1803 = vmatprep.subr.mxu1 %v2300_v3 }
 0x136   :  { %2243 = vmatpush3.msra.mxu0 %v468_v35  ;;  %1804 = vmatpush2.msra.mxu1 %v512_v47 }
 0x137   :  { %2244 = vmatprep.subr.mxu0 %v483_v48  ;;  %1805 = vmatprep.subr.mxu1 %v2300_v3 }
 0x138   :  { %2245 = vmatpush3.msra.mxu0 %v467_v50  ;;  %1806 = vmatpush2.msra.mxu1 %v511_v51 }
 0x139   :  { %2246 = vmatprep.subr.mxu0 %v482_v52  ;;  %1807 = vmatprep.subr.mxu1 %v2300_v3 }
 0x13a   :  { %2247 = vmatpush3.msra.mxu0 %v466_v53  ;;  %1808 = vmatpush2.msra.mxu1 %v510_v54 }
 0x13b   :  { %2248 = vmatprep.subr.mxu0 %v481_v17  ;;  %1809 = vmatprep.subr.mxu1 %v2300_v3 }
 0x13c   :  { %2249 = vmatpush3.msra.mxu0 %v465_v56  ;;  %1745 = vmatprep.mubr.f32.mxu0 %v1530_v55 }
 0x13d   :  { %2250 = vmatprep.subr.mxu0 %v480_v57  ;;  %1810 = vmatpush2.msra.mxu1 %v509_v58 }
 0x13e   :  { %2251 = vmatpush3.msra.mxu0 %v464_v60  ;;  %1811 = vmatprep.subr.mxu1 %v2300_v3 }
 0x13f   :  { %2252 = vmatprep.subr.mxu0 %v479_v61  ;;  %1812 = vmatpush2.msra.mxu1 %v508_v62 }
 0x140   :  { %2253 = vmatpush3.msra.mxu0 %v463_v40  ;;  %1813 = vmatprep.subr.mxu1 %v2300_v3  ;;  %v475_v3 = vld [vmem:[%s4029_s1 + $0xe38] sm:$0xff]  ;;  %s2302_s1 = smov [#allocation2]  }
 0x141   :  { %2254 = vmatprep.subr.mxu0 %v478_v63  ;;  %1814 = vmatpush2.msra.mxu1 %v507_v0  ;;  %s1830_s15 = sshll.u32 %s2302_s1, 4  ;;  %s1831_s15 = int_to_ptr.vmem [resolvable:$true] %s1830_s15 }
 0x142   :  { %2255 = vmatpush3.msra.mxu0 %v462_v2  ;;  %1844 = vmatprep.mubr.msk.f32.mxu1 %vm563_vm0, %v1531_v1  ;;  %s2278_s16 = scalar_lea.vmem %s1831_s15, 128  ;;  %p2283_p1 = scmp.lt.s32.totalorder %s1831_s15, %s1831_s15 }
 0x143   :  { %2256 = vmatprep.subr.mxu0 %v477_v4  ;;  %1816 = vmatmul.mubr.f32.vlgmr.msra.gmra.mxu1 %v1529_v59  ;;  %p2279_p0 = scmp.ne.s32.totalorder %s1831_s15, %s2278_s16  ;;  %p2284_p2 = scmp.lt.s32.totalorder %s2278_s16, %s2278_s16 }
 0x144   :  { %2257 = vmatpush3.msra.mxu0 %v461_v5 }
 0x145   :  { %2258 = vmatprep.subr.mxu0 %v476_v6  ;;  %p2285_p3 = por %p2284_p2, %p2283_p1 }
 0x146   :  { %2259 = vmatpush3.msra.mxu0 %v460_v7 }
 0x147   :  { %2260 = vmatprep.subr.mxu0 %v475_v3  ;;  %p2286_p4 = pnand %p2285_p3, %p2279_p0 }
 0x148   :  { %2261 = vmatpush3.msra.mxu0 %v459_v9  ;;  %v1982_v14 = vpop.f32.mrf.mxu0 }
 0x149   :  { %1746 = vmatmul.mubr.f32.vlgmr.msra.gmra.mxu0 %v1522_v49 }
 0x14a   :  { %v1983_v15 = vpop.f32.mrf.mxu0 }
 0x14b   :  { %v1984_v16 = vadd.f32 %v1983_v15, %v1982_v14 }
 0x14d   :  { %v1028_v23 = vadd.f32 %v2019_v20, %v1984_v16 }
 0x15f   :  { %v1167_v12 = vpop.f32.mrf.mxu1 }
 0x161   :  { %v1169_v13 = vpop.f32.mrf.mxu1 }
 0x16a   :  { %v2052_v19 = vpop.f32.mrf.mxu0 }
 0x16c   :  { %v2053_v21 = vpop.f32.mrf.mxu0 }
 0x16d   :  { %v2054_v24 = vadd.f32 %v2053_v21, %v2052_v19 }
 0x16f   :  { %v1098_v18 = vadd.f32 %v2054_v24, %v1028_v23 }
 0x171   :  { %v1168_v25 = vadd.f32 %v1167_v12, %v1098_v18 }
 0x173   :  { %1822 = vst [vmem:[#allocation2 + $0x2] sm:$0x3] %v1168_v25 }
 0x181   :  { %v2157_v30 = vpop.f32.mrf.mxu1 }
 0x183   :  { %v2158_v33 = vpop.f32.mrf.mxu1 }
 0x184   :  { %v2159_v37 = vadd.f32 %v2158_v33, %v2157_v30 }
 0x18c   :  { %v2087_v26 = vpop.f32.mrf.mxu0 }
 0x18e   :  { %v2088_v27 = vpop.f32.mrf.mxu0 }
 0x18f   :  { %v2089_v32 = vadd.f32 %v2088_v27, %v2087_v26 }
 0x1a3   :  { %v2192_v22 = vpop.f32.mrf.mxu1 }
 0x1a5   :  { %v2193_v36 = vpop.f32.mrf.mxu1 }
 0x1a6   :  { %v2194_v48 = vadd.f32 %v2193_v36, %v2192_v22 }
 0x1ae   :  { %v2122_v28 = vpop.f32.mrf.mxu0 }
 0x1b0   :  { %v2123_v29 = vpop.f32.mrf.mxu0 }
 0x1b1   :  { %v2124_v31 = vadd.f32 %v2123_v29, %v2122_v28 }
 0x1b3   :  { %v1353_v34 = vadd.f32 %v2124_v31, %v2089_v32 }
 0x1b5   :  { %v1423_v38 = vadd.f32 %v2159_v37, %v1353_v34 }
 0x1c4   :  { %v2227_v43 = vpop.f32.mrf.mxu1 }
 0x1c6   :  { %v2228_v44 = vpop.f32.mrf.mxu1 }
 0x1c7   :  { %v2229_v35 = vadd.f32 %v2228_v44, %v2227_v43 }
 0x1c9   :  { %v1678_v50 = vadd.f32 %v2229_v35, %v2194_v48 }
 0x1e9   :  { %v1492_v39 = vpop.f32.mrf.mxu0 }
 0x1ea   :  { %v1493_v41 = vadd.f32 %v1492_v39, %v1423_v38 }
 0x1eb   :  { %v1494_v42 = vpop.f32.mrf.mxu0 }
 0x1ec   :  { %1823 = vst [vmem:[#allocation2 + $0x4] sm:$0x3] %v1493_v41 }
 0x203   :  { %v1817_v45 = vpop.f32.mrf.mxu1 }
 0x205   :  { %v1819_v46 = vpop.f32.mrf.mxu1 }
 0x209   :  { %v2262_v47 = vpop.f32.mrf.mxu0 }
 0x20b   :  { %v2263_v49 = vpop.f32.mrf.mxu0 }
 0x20c   :  { %v2264_v51 = vadd.f32 %v2263_v49, %v2262_v47 }
 0x20e   :  { %v1748_v52 = vadd.f32 %v2264_v51, %v1678_v50 }
 0x210   :  { %v1818_v8 = vadd.f32 %v1817_v45, %v1748_v52 }
 0x212   :  { %1824 = vst [vmem:[#allocation2 + $0x6] sm:$0x3] %v1818_v8 }
 0x213   :  { %2289 = shalt.err (!%p2286_p4)
}
 0x214   :  { %s2303_s17 = smov 32   ;;  %s2304_s18 = smov 2  }
 0x215   :  { %1836 = dma.vmem_to_hbm [thread:$0]  %s1831_s15, 128, %s4030_s2, [#allocation3], %s2303_s17, %s2303_s17, %s2304_s18  }
 0x216   :  { %2298 = dma.done.wait [#allocation3], 128  }
 0x217   :  { %2299 = vsyncadd [#allocation3], 4294967168 }
 0x218   :  { %1840 = vsyncpa [#allocation3], 1 }

</bundles_post_ra>
